<compile_context>
chip_gen: v7x
topology: tpu7x:2x2x1
jax: 0.10.0
libtpu: 0.0.40
codegen_flags: <defaults>
</compile_context>

<pallas_src>
import functools

import numpy as np

import jax
import jax.numpy as jnp
from jax.experimental import pallas as pl
from jax.experimental.pallas import tpu as pltpu


# ---------------------------------------------------------------------------
# Canonical activation layout helpers.
#   canonical(H, W): Hpad = H + 4 (2 top / 2 bottom zero rows),
#                    Wpad = round_up(W + 2, 16) (1 left zero col, rest right).
#   valid pixel (y, x) lives at flat row (y + 2) * Wpad + (x + 1).
# ---------------------------------------------------------------------------
def _round_up(x, m):
    return (x + m - 1) // m * m


def _canon_dims(H, W):
    return H + 4, _round_up(W + 2, 16)


def _vmem_limit_bytes():
    cap = 64 * 1024 * 1024
    try:
        info = pltpu.get_tpu_info()
        cap = int(getattr(info, "vmem_capacity_bytes", cap))
    except Exception:
        pass
    # ~96 MiB on v5e/v6e (128 MiB physical), ~48 MiB on v7x (64 MiB physical).
    return int(min(100 * 1024 * 1024, max(32 * 1024 * 1024, (cap * 3) // 4)))


_VMEM_LIMIT = _vmem_limit_bytes()


# ---------------------------------------------------------------------------
# Fused conv3x3 + bias + ReLU (+ optional fused 2x2 max-pool) Pallas kernel.
# The kernel writes the full canonical output block (data + zero halo).
# ---------------------------------------------------------------------------
def _conv_kernel(x_ref, w_ref, b_ref, *rest,
                 Mc, H, Wpad, Wpad_out, Cin, ksize, merge_k, pool):
    """One (batch|folded-batch, cout-block) tile.

    x_ref : (rows_in, Cin)        bf16  canonical padded input slab
    w_ref : (9*Cin | 32, tco)     bf16  weights, rows ordered (dy, dx, cin)
    b_ref : (1, tco)              f32   bias
    mi_ref: (Mc, 1)               f32   validity mask for the conv body rows
    mo_ref: (Mo, 1)               f32   validity mask for pooled body rows
    o_ref : (rows_out, tco)       bf16  canonical padded output slab
    ps    : (8 + Mc + Wpad, tco)  f32   pool scratch (pool=True only)
    """
    if pool:
        mi_ref, mo_ref, o_ref, ps = rest
    else:
        mi_ref, o_ref = rest

    tco = o_ref.shape[-1]
    f32 = jnp.float32

    # ---- 3x3 conv as 3 (merged-K) or 9 large matmuls, f32 accumulation. ----
    if ksize == 3:
        span = Mc + 2 * Wpad
        xl = x_ref[pl.ds(Wpad - 1, span), :]        # dx = 0 phase (shift -1)
        xr = x_ref[pl.ds(Wpad + 1, span), :]        # dx = 2 phase (shift +1)
        acc = None
        for dy in range(3):
            lo = dy * Wpad
            xc = x_ref[pl.ds((dy + 1) * Wpad, Mc), :]   # dx = 1, aligned slice
            ltap = xl[lo:lo + Mc]
            rtap = xr[lo:lo + Mc]
            if merge_k:
                lhs = jnp.concatenate([ltap, xc, rtap], axis=-1)   # (Mc, 3*Cin)
                p = jnp.dot(lhs, w_ref[pl.ds(dy * 3 * Cin, 3 * Cin), :],
                            preferred_element_type=f32)
                acc = p if acc is None else acc + p
            else:
                for dxi, lhs in enumerate((ltap, xc, rtap)):
                    t = dy * 3 + dxi
                    p = jnp.dot(lhs, w_ref[pl.ds(t * Cin, Cin), :],
                                preferred_element_type=f32)
                    acc = p if acc is None else acc + p
    else:                                            # 1x1 (im2col'ed first layer)
        acc = jnp.dot(x_ref[pl.ds(2 * Wpad, Mc), :], w_ref[...],
                      preferred_element_type=f32)

    # bias + ReLU + zero-out borders / junk columns / inter-image rows.
    y = jnp.maximum(acc + b_ref[...], 0.0) * mi_ref[...]          # (Mc, tco) f32

    if pool:
        # Vectorised 2x2 max-pool on the flat (row-major padded) layout.
        ps[pl.ds(0, 8), :] = jnp.zeros((8, tco), f32)
        ps[pl.ds(8, Mc), :] = y
        ps[pl.ds(8 + Mc, Wpad), :] = jnp.zeros((Wpad, tco), f32)
        ext = Mc + Wpad
        # yh[m] = max(y[m-1], y[m])  (horizontal pair, even-column registration)
        yh = jnp.maximum(ps[pl.ds(7, ext), :], ps[pl.ds(8, ext), :])
        # yp[m] = max(yh[m], yh[m+Wpad])  (vertical pair)
        yp = jnp.maximum(yh[:Mc], yh[Wpad:Wpad + Mc])
        ps[pl.ds(0, Mc), :] = yp
        q = ps[pl.ds(0, Mc // 2, stride=2), :]       # even flat rows, (H//2*Wpad, tco)
        q = q.reshape(H // 2, Wpad, tco)[:, :Wpad_out, :]
        body = q.reshape((H // 2) * Wpad_out, tco) * mo_ref[...]
    else:
        body = y

    # Single dense store of the canonical output block (data + zero halo).
    Mo = body.shape[0]
    zb = jnp.zeros((2 * Wpad_out, tco), o_ref.dtype)
    o_ref[pl.ds(0, 2 * Wpad_out), :] = zb
    o_ref[pl.ds(2 * Wpad_out, Mo), :] = body.astype(o_ref.dtype)
    o_ref[pl.ds(2 * Wpad_out + Mo, 2 * Wpad_out), :] = zb


# ---------------------------------------------------------------------------
# Layer wrapper (layout glue only; all FLOPs run inside the Pallas kernel).
# ---------------------------------------------------------------------------
def conv_layer(x_flat, w, b, *, N, H, W, Cin, pool, first=False,
               fold_override=None):
    """x_flat: canonical (N*(H+4)*Wpad, Cin|32) bf16.  Returns canonical output."""
    Cout = w.shape[-1]
    Hpad, Wpad = _canon_dims(H, W)
    H_out, W_out = (H // 2, W // 2) if pool else (H, W)
    Hpad_o, Wpad_o = _canon_dims(H_out, W_out)
    rows_in, rows_out = Hpad * Wpad, Hpad_o * Wpad_o

    if pool:
        assert H % 2 == 0 and W % 2 == 0, (H, W)
    assert H >= 1 and W >= 2, (H, W)

    if first:
        Kw = x_flat.shape[-1]                       # 32 (im2col'ed, padded)
        wm = jnp.pad(w.reshape(9 * Cin, Cout),
                     ((0, Kw - 9 * Cin), (0, 0))).astype(jnp.bfloat16)
        Cin_k, ksize, merge_k = Kw, 1, False
    else:
        wm = w.reshape(9 * Cin, Cout).astype(jnp.bfloat16)
        Cin_k, ksize, merge_k = Cin, 3, (Cin == 128)
    bm = b.reshape(1, Cout).astype(jnp.float32)
    assert x_flat.shape == (N * rows_in, Cin_k), (x_flat.shape, N * rows_in, Cin_k)

    tco = min(Cout, 256)
    assert Cout % tco == 0
    n_co = Cout // tco

    # Fold the batch into M for small (deep) non-pool layers.
    fold = (not pool) and (N * rows_in * max(Cin_k, Cout) <= (2 << 20))
    if fold_override is not None:
        fold = bool(fold_override) and (not pool)

    if fold:
        Mc = N * rows_in - 4 * Wpad
        grid = (n_co,)
        x_idx = lambda j: (0, 0)
        w_idx = lambda j: (0, j)
        m_idx = lambda j: (0, 0)
        o_idx = lambda j: (0, j)
        x_block = (N * rows_in, Cin_k)
        o_block = (N * rows_out, tco)
        dims = ("parallel",)
    else:
        Mc = H * Wpad
        # Keep the larger operand resident across the inner grid axis.
        w_resident = wm.size * 2 > rows_in * Cin_k * 2
        if w_resident:
            grid = (n_co, N)
            x_idx = lambda j, n: (n, 0)
            w_idx = lambda j, n: (0, j)
            m_idx = lambda j, n: (0, 0)
            o_idx = lambda j, n: (n, j)
        else:
            grid = (N, n_co)
            x_idx = lambda n, j: (n, 0)
            w_idx = lambda n, j: (0, j)
            m_idx = lambda n, j: (0, 0)
            o_idx = lambda n, j: (n, j)
        x_block = (rows_in, Cin_k)
        o_block = (rows_out, tco)
        dims = ("parallel", "parallel")

    # Host-precomputed validity masks (static, tiny).
    m_abs = np.arange(Mc, dtype=np.int64) + 2 * Wpad
    col = m_abs % Wpad
    rowr = (m_abs // Wpad) % Hpad
    in_mask = ((col >= 1) & (col <= W) & (rowr >= 2) & (rowr < Hpad - 2))
    mi = jnp.asarray(in_mask.astype(np.float32).reshape(Mc, 1))

    call_args = [x_flat, wm, bm, mi]
    in_specs = [
        pl.BlockSpec(x_block, x_idx),
        pl.BlockSpec((wm.shape[0], tco), w_idx),
        pl.BlockSpec((1, tco), w_idx),
        pl.BlockSpec((Mc, 1), m_idx),
    ]
    scratch = []
    if pool:
        Mo = H_out * Wpad_o
        ocol = np.arange(Mo, dtype=np.int64) % Wpad_o
        out_mask = (ocol >= 1) & (ocol <= W_out)
        mo = jnp.asarray(out_mask.astype(np.float32).reshape(Mo, 1))
        call_args.append(mo)
        in_specs.append(pl.BlockSpec((Mo, 1), m_idx))
        scratch = [pltpu.VMEM((8 + Mc + Wpad, tco), jnp.float32)]

    kernel = functools.partial(
        _conv_kernel, Mc=Mc, H=H, Wpad=Wpad, Wpad_out=Wpad_o,
        Cin=Cin_k, ksize=ksize, merge_k=merge_k, pool=pool)

    return pl.pallas_call(
        kernel,
        out_shape=jax.ShapeDtypeStruct((N * rows_out, Cout), jnp.bfloat16),
        grid_spec=pltpu.PrefetchScalarGridSpec(
            num_scalar_prefetch=0,
            grid=grid,
            in_specs=in_specs,
            out_specs=pl.BlockSpec(o_block, o_idx),
            scratch_shapes=scratch),
        compiler_params=pltpu.CompilerParams(
            dimension_semantics=dims,
            vmem_limit_bytes=_VMEM_LIMIT),
    )(*call_args)


# ---------------------------------------------------------------------------
# Canonical-layout conversions (XLA-level glue, first/last layers only).
# ---------------------------------------------------------------------------
def _to_canonical(x_nhwc):
    N, H, W, C = x_nhwc.shape
    Hpad, Wpad = _canon_dims(H, W)
    xp = jnp.pad(x_nhwc.astype(jnp.bfloat16),
                 ((0, 0), (2, 2), (1, Wpad - W - 1), (0, 0)))
    return xp.reshape(N * Hpad * Wpad, C)


def _from_canonical(flat, N, H, W, C):
    Hpad, Wpad = _canon_dims(H, W)
    return flat.reshape(N, Hpad, Wpad, C)[:, 2:2 + H, 1:1 + W, :]


def _first_layer_input(x_nhwc):
    """conv1_1 (Cin=3): im2col to K=32 in the wrapper, placed in canonical layout."""
    N, H, W, C = x_nhwc.shape                       # C == 3
    Hpad, Wpad = _canon_dims(H, W)
    xp = jnp.pad(x_nhwc, ((0, 0), (1, 1), (1, 1), (0, 0)))
    cols = jnp.concatenate(
        [xp[:, dy:dy + H, dx:dx + W, :] for dy in range(3) for dx in range(3)],
        axis=-1)                                    # (N, H, W, 27)
    K = 32
    cols = jnp.pad(cols, ((0, 0), (0, 0), (0, 0), (0, K - 9 * C)))
    canon = jnp.pad(cols, ((0, 0), (2, 2), (1, Wpad - W - 1), (0, 0)))
    return canon.astype(jnp.bfloat16).reshape(N * Hpad * Wpad, K)


# ---------------------------------------------------------------------------
# VGG19 feature slices (torchvision features[0:30]) — 13 convs + 4 fused pools.
# ---------------------------------------------------------------------------
_VGG19_LAYERS = [
    # (cin, cout, fuse_pool_after, capture_output)
    (3,   64,  False, True),    # conv1_1 -> h_relu1
    (64,  64,  True,  False),   # conv1_2 + maxpool
    (64,  128, False, True),    # conv2_1 -> h_relu2
    (128, 128, True,  False),   # conv2_2 + maxpool
    (128, 256, False, True),    # conv3_1 -> h_relu3
    (256, 256, False, False),   # conv3_2
    (256, 256, False, False),   # conv3_3
    (256, 256, True,  False),   # conv3_4 + maxpool
    (256, 512, False, True),    # conv4_1 -> h_relu4
    (512, 512, False, False),   # conv4_2
    (512, 512, False, False),   # conv4_3
    (512, 512, True,  False),   # conv4_4 + maxpool
    (512, 512, False, True),    # conv5_1 -> h_relu5
]


def init_vgg19_params(key):
    params = []
    for cin, cout, _, _ in _VGG19_LAYERS:
        key, kw, kb = jax.random.split(key, 3)
        std = (2.0 / (9 * cin)) ** 0.5
        w = std * jax.random.normal(kw, (3, 3, cin, cout), jnp.float32)
        b = 0.01 * jax.random.normal(kb, (cout,), jnp.float32)
        params.append((w, b))
    return params


def vgg19_forward(x_nchw, params):
    """Reproduces Vgg19.forward: returns [h_relu1, ..., h_relu5] in NCHW."""
    x = jnp.transpose(x_nchw, (0, 2, 3, 1)).astype(jnp.float32)   # NCHW -> NHWC
    N, H, W, _ = x.shape
    flat = _first_layer_input(x)
    outs = []
    curH, curW = H, W
    for idx, ((cin, cout, pool, capture), (w, b)) in enumerate(
            zip(_VGG19_LAYERS, params)):
        flat = conv_layer(flat, w, b, N=N, H=curH, W=curW, Cin=cin,
                          pool=pool, first=(idx == 0))
        if pool:
            curH, curW = curH // 2, curW // 2
        if capture:
            outs.append(_from_canonical(flat, N, curH, curW, cout)
                        .astype(jnp.float32))
    return [jnp.transpose(o, (0, 3, 1, 2)) for o in outs]


# ---------------------------------------------------------------------------
# Pure-JAX reference (same per-layer bf16 quantization points; for correctness).
# ---------------------------------------------------------------------------
def _ref_layer(h, w, b, pool):
    y = jax.lax.conv_general_dilated(
        h.astype(jnp.bfloat16), w.astype(jnp.bfloat16),
        window_strides=(1, 1), padding="SAME",
        dimension_numbers=("NHWC", "HWIO", "NHWC"),
        preferred_element_type=jnp.float32)
    y = jnp.maximum(y + b.astype(jnp.float32), 0.0)
    if pool:
        y = jax.lax.reduce_window(y, -jnp.inf, jax.lax.max,
                                  (1, 2, 2, 1), (1, 2, 2, 1), "VALID")
    return y.astype(jnp.bfloat16)


def ref_forward(x_nchw, params):
    h = jnp.transpose(x_nchw, (0, 2, 3, 1)).astype(jnp.float32)
    outs = []
    for (_, _, pool, capture), (w, b) in zip(_VGG19_LAYERS, params):
        h = _ref_layer(h, w, b, pool)
        if capture:
            outs.append(h)
    return [jnp.transpose(o.astype(jnp.float32), (0, 3, 1, 2)) for o in outs]


# ---------------------------------------------------------------------------
# Single-layer geometry self-tests (H != W, W not a multiple of 16, fold paths).
# ---------------------------------------------------------------------------
def _single_layer_check(key, *, N, H, W, Cin, Cout, pool, fold_override=None):
    kx, kw, kb = jax.random.split(key, 3)
    x = jax.random.normal(kx, (N, H, W, Cin), jnp.float32)
    wgt = (2.0 / (9 * Cin)) ** 0.5 * jax.random.normal(
        kw, (3, 3, Cin, Cout), jnp.float32)
    bias = 0.01 * jax.random.normal(kb, (Cout,), jnp.float32)
    xb = x.astype(jnp.bfloat16)
    out = conv_layer(_to_canonical(xb), wgt, bias, N=N, H=H, W=W, Cin=Cin,
                     pool=pool, fold_override=fold_override)
    Ho, Wo = (H // 2, W // 2) if pool else (H, W)
    got = _from_canonical(out, N, Ho, Wo, Cout).astype(jnp.float32)
    ref = _ref_layer(xb.astype(jnp.float32), wgt, bias, pool).astype(jnp.float32)
    rel = float(jnp.linalg.norm(got - ref) / (jnp.linalg.norm(ref) + 1e-6))
    assert rel < 2e-2, f"single-layer check failed (rel={rel})"


if __name__ == "__main__":
    key = jax.random.PRNGKey(0)
    k1, k2, k3, kx, kp = jax.random.split(key, 5)

    # Geometry self-tests: H != W, non-multiple-of-16 widths, all code paths.
    _single_layer_check(k1, N=1, H=6, W=10, Cin=128, Cout=128, pool=True)
    _single_layer_check(k2, N=2, H=4, W=6, Cin=64, Cout=64, pool=False,
                        fold_override=False)
    _single_layer_check(k3, N=2, H=4, W=6, Cin=256, Cout=256, pool=False,
                        fold_override=True)

    # Small but VGG-consistent input: NCHW, 3 channels, spatial divisible by 16.
    x = jax.random.normal(kx, (2, 3, 32, 32), jnp.float32)
    params = init_vgg19_params(kp)

    outs = jax.block_until_ready(jax.jit(vgg19_forward)(x, params))
    refs = jax.block_until_ready(jax.jit(ref_forward)(x, params))

    expected_shapes = [(2, 64, 32, 32), (2, 128, 16, 16), (2, 256, 8, 8),
                       (2, 512, 4, 4), (2, 512, 2, 2)]
    for o, r, s in zip(outs, refs, expected_shapes):
        assert o.shape == s, (o.shape, s)
        assert r.shape == s, (r.shape, s)
        # Both pipelines quantize to bf16 at the same points; only the tap /
        # reduction order differs, so errors stay near the bf16 noise floor.
        rel = float(jnp.linalg.norm(o - r) / (jnp.linalg.norm(r) + 1e-6))
        max_err = float(jnp.max(jnp.abs(o - r)))
        scale = float(jnp.max(jnp.abs(r))) + 1e-6
        assert rel < 3e-2, f"relative error too large: {rel}"
        assert max_err < 0.1 * scale, f"max-abs error too large: {max_err} / {scale}"

    print("KERNEL_OK")
</pallas_src>

<mosaic_0001>
module attributes {stable_mosaic.version = 11 : i64} {
  func.func @_conv_kernel(%arg0: i32, %arg1: i32, %arg2: memref<160x128xbf16, #tpu.memory_space<vmem>>, %arg3: memref<1152x128xbf16, #tpu.memory_space<vmem>>, %arg4: memref<1x128xf32, #tpu.memory_space<vmem>>, %arg5: memref<96x1xf32, #tpu.memory_space<vmem>>, %arg6: memref<48x1xf32, #tpu.memory_space<vmem>>, %arg7: memref<112x128xbf16, #tpu.memory_space<vmem>>, %arg8: memref<120x128xf32, #tpu.memory_space<vmem>>) attributes {dimension_semantics = [#tpu.dimension_semantics<parallel>, #tpu.dimension_semantics<parallel>], iteration_bounds = array<i64: 1, 1>, scalar_prefetch = 0 : i64, scratch_operands = 1 : i64, tpu.core_type = #tpu.core_type<tc>, window_params = [{transform_indices = @transform_0, window_bounds = array<i64: 160, 128>}, {transform_indices = @transform_1, window_bounds = array<i64: 1152, 128>}, {transform_indices = @transform_2, window_bounds = array<i64: 1, 128>}, {pipeline_mode = #tpu.pipeline_mode<synchronous>, transform_indices = @transform_3, window_bounds = array<i64: 96, 1>}, {pipeline_mode = #tpu.pipeline_mode<synchronous>, transform_indices = @transform_4, window_bounds = array<i64: 48, 1>}, {transform_indices = @transform_5, window_bounds = array<i64: 112, 128>}]} {
    %c15 = arith.constant 15 : index
    %c0 = arith.constant 0 : index
    %0 = vector.load %arg2[%c15, %c0] : memref<160x128xbf16, #tpu.memory_space<vmem>>, vector<128x128xbf16>
    %c17 = arith.constant 17 : index
    %c0_0 = arith.constant 0 : index
    %1 = vector.load %arg2[%c17, %c0_0] : memref<160x128xbf16, #tpu.memory_space<vmem>>, vector<128x128xbf16>
    %c16 = arith.constant 16 : index
    %c0_1 = arith.constant 0 : index
    %2 = vector.load %arg2[%c16, %c0_1] : memref<160x128xbf16, #tpu.memory_space<vmem>>, vector<96x128xbf16>
    %3 = vector.extract_strided_slice %0 {offsets = [0, 0], sizes = [96, 128], strides = [1, 1]} : vector<128x128xbf16> to vector<96x128xbf16>
    %4 = vector.extract_strided_slice %1 {offsets = [0, 0], sizes = [96, 128], strides = [1, 1]} : vector<128x128xbf16> to vector<96x128xbf16>
    %5 = tpu.concatenate %3, %2, %4 in 1 : vector<96x128xbf16>, vector<96x128xbf16>, vector<96x128xbf16> -> vector<96x384xbf16>
    %c0_2 = arith.constant 0 : index
    %c0_3 = arith.constant 0 : index
    %6 = vector.load %arg3[%c0_2, %c0_3] : memref<1152x128xbf16, #tpu.memory_space<vmem>>, vector<384x128xbf16>
    %cst = arith.constant dense<0.000000e+00> : vector<96x128xf32>
    %7 = tpu.matmul %5, %6, %cst {dimension_numbers = #tpu.dot_dimension_numbers<[1], [0], [0], [1], [0, 0, 1, 1], [], []>} : vector<96x384xbf16>, vector<384x128xbf16>, vector<96x128xf32> -> vector<96x128xf32>
    %c32 = arith.constant 32 : index
    %c0_4 = arith.constant 0 : index
    %8 = vector.load %arg2[%c32, %c0_4] : memref<160x128xbf16, #tpu.memory_space<vmem>>, vector<96x128xbf16>
    %9 = vector.extract_strided_slice %0 {offsets = [16, 0], sizes = [96, 128], strides = [1, 1]} : vector<128x128xbf16> to vector<96x128xbf16>
    %10 = vector.extract_strided_slice %1 {offsets = [16, 0], sizes = [96, 128], strides = [1, 1]} : vector<128x128xbf16> to vector<96x128xbf16>
    %11 = tpu.concatenate %9, %8, %10 in 1 : vector<96x128xbf16>, vector<96x128xbf16>, vector<96x128xbf16> -> vector<96x384xbf16>
    %c384 = arith.constant 384 : index
    %c0_5 = arith.constant 0 : index
    %12 = vector.load %arg3[%c384, %c0_5] : memref<1152x128xbf16, #tpu.memory_space<vmem>>, vector<384x128xbf16>
    %cst_6 = arith.constant dense<0.000000e+00> : vector<96x128xf32>
    %13 = tpu.matmul %11, %12, %cst_6 {dimension_numbers = #tpu.dot_dimension_numbers<[1], [0], [0], [1], [0, 0, 1, 1], [], []>} : vector<96x384xbf16>, vector<384x128xbf16>, vector<96x128xf32> -> vector<96x128xf32>
    %14 = arith.addf %7, %13 : vector<96x128xf32>
    %c48 = arith.constant 48 : index
    %c0_7 = arith.constant 0 : index
    %15 = vector.load %arg2[%c48, %c0_7] : memref<160x128xbf16, #tpu.memory_space<vmem>>, vector<96x128xbf16>
    %16 = vector.extract_strided_slice %0 {offsets = [32, 0], sizes = [96, 128], strides = [1, 1]} : vector<128x128xbf16> to vector<96x128xbf16>
    %17 = vector.extract_strided_slice %1 {offsets = [32, 0], sizes = [96, 128], strides = [1, 1]} : vector<128x128xbf16> to vector<96x128xbf16>
    %18 = tpu.concatenate %16, %15, %17 in 1 : vector<96x128xbf16>, vector<96x128xbf16>, vector<96x128xbf16> -> vector<96x384xbf16>
    %c768 = arith.constant 768 : index
    %c0_8 = arith.constant 0 : index
    %19 = vector.load %arg3[%c768, %c0_8] : memref<1152x128xbf16, #tpu.memory_space<vmem>>, vector<384x128xbf16>
    %cst_9 = arith.constant dense<0.000000e+00> : vector<96x128xf32>
    %20 = tpu.matmul %18, %19, %cst_9 {dimension_numbers = #tpu.dot_dimension_numbers<[1], [0], [0], [1], [0, 0, 1, 1], [], []>} : vector<96x384xbf16>, vector<384x128xbf16>, vector<96x128xf32> -> vector<96x128xf32>
    %21 = arith.addf %14, %20 : vector<96x128xf32>
    %c0_10 = arith.constant 0 : index
    %c0_11 = arith.constant 0 : index
    %22 = vector.load %arg4[%c0_10, %c0_11] : memref<1x128xf32, #tpu.memory_space<vmem>>, vector<1x128xf32>
    %23 = vector.broadcast %22 : vector<1x128xf32> to vector<96x128xf32>
    %24 = arith.addf %21, %23 : vector<96x128xf32>
    %cst_12 = arith.constant 0.000000e+00 : f32
    %25 = vector.broadcast %cst_12 : f32 to vector<96x128xf32>
    %26 = arith.maximumf %24, %25 : vector<96x128xf32>
    %c0_13 = arith.constant 0 : index
    %c0_14 = arith.constant 0 : index
    %27 = vector.load %arg5[%c0_13, %c0_14] : memref<96x1xf32, #tpu.memory_space<vmem>>, vector<96x1xf32>
    %28 = vector.broadcast %27 : vector<96x1xf32> to vector<96x128xf32>
    %29 = arith.mulf %26, %28 : vector<96x128xf32>
    %cst_15 = arith.constant 0.000000e+00 : f32
    %30 = vector.broadcast %cst_15 : f32 to vector<8x128xf32>
    %c0_16 = arith.constant 0 : index
    %c0_17 = arith.constant 0 : index
    %31 = vector.load %arg8[%c0_16, %c0_17] : memref<120x128xf32, #tpu.memory_space<vmem>>, vector<8x128xf32>
    tpu.vector_store %arg8[%c0_16, %c0_17], %30 {strides = array<i32>} : memref<120x128xf32, #tpu.memory_space<vmem>>, vector<8x128xf32>,
    %c8 = arith.constant 8 : index
    %c0_18 = arith.constant 0 : index
    %32 = vector.load %arg8[%c8, %c0_18] : memref<120x128xf32, #tpu.memory_space<vmem>>, vector<96x128xf32>
    tpu.vector_store %arg8[%c8, %c0_18], %29 {strides = array<i32>} : memref<120x128xf32, #tpu.memory_space<vmem>>, vector<96x128xf32>,
    %cst_19 = arith.constant 0.000000e+00 : f32
    %33 = vector.broadcast %cst_19 : f32 to vector<16x128xf32>
    %c104 = arith.constant 104 : index
    %c0_20 = arith.constant 0 : index
    %34 = vector.load %arg8[%c104, %c0_20] : memref<120x128xf32, #tpu.memory_space<vmem>>, vector<16x128xf32>
    tpu.vector_store %arg8[%c104, %c0_20], %33 {strides = array<i32>} : memref<120x128xf32, #tpu.memory_space<vmem>>, vector<16x128xf32>,
    %c7 = arith.constant 7 : index
    %c0_21 = arith.constant 0 : index
    %35 = vector.load %arg8[%c7, %c0_21] : memref<120x128xf32, #tpu.memory_space<vmem>>, vector<112x128xf32>
    %c8_22 = arith.constant 8 : index
    %c0_23 = arith.constant 0 : index
    %36 = vector.load %arg8[%c8_22, %c0_23] : memref<120x128xf32, #tpu.memory_space<vmem>>, vector<112x128xf32>
    %37 = arith.maximumf %35, %36 : vector<112x128xf32>
    %38 = vector.extract_strided_slice %37 {offsets = [0, 0], sizes = [96, 128], strides = [1, 1]} : vector<112x128xf32> to vector<96x128xf32>
    %39 = vector.extract_strided_slice %37 {offsets = [16, 0], sizes = [96, 128], strides = [1, 1]} : vector<112x128xf32> to vector<96x128xf32>
    %40 = arith.maximumf %38, %39 : vector<96x128xf32>
    %c0_24 = arith.constant 0 : index
    %c0_25 = arith.constant 0 : index
    %41 = vector.load %arg8[%c0_24, %c0_25] : memref<120x128xf32, #tpu.memory_space<vmem>>, vector<96x128xf32>
    tpu.vector_store %arg8[%c0_24, %c0_25], %40 {strides = array<i32>} : memref<120x128xf32, #tpu.memory_space<vmem>>, vector<96x128xf32>,
    %c0_26 = arith.constant 0 : index
    %c0_27 = arith.constant 0 : index
    %42 = tpu.strided_load %arg8[%c0_26, %c0_27] {strides = array<i32: 2, 1>} : memref<120x128xf32, #tpu.memory_space<vmem>>, vector<48x128xf32>
    %43 = vector.shape_cast %42 : vector<48x128xf32> to vector<3x16x128xf32>
    %44 = vector.shape_cast %43 : vector<3x16x128xf32> to vector<48x128xf32>
    %c0_28 = arith.constant 0 : index
    %c0_29 = arith.constant 0 : index
    %45 = vector.load %arg6[%c0_28, %c0_29] : memref<48x1xf32, #tpu.memory_space<vmem>>, vector<48x1xf32>
    %46 = vector.broadcast %45 : vector<48x1xf32> to vector<48x128xf32>
    %47 = arith.mulf %44, %46 : vector<48x128xf32>
    %cst_30 = arith.constant 0.000000e+00 : bf16
    %48 = vector.broadcast %cst_30 : bf16 to vector<32x128xbf16>
    %c0_31 = arith.constant 0 : index
    %c0_32 = arith.constant 0 : index
    %49 = vector.load %arg7[%c0_31, %c0_32] : memref<112x128xbf16, #tpu.memory_space<vmem>>, vector<32x128xbf16>
    tpu.vector_store %arg7[%c0_31, %c0_32], %48 {strides = array<i32>} : memref<112x128xbf16, #tpu.memory_space<vmem>>, vector<32x128xbf16>,
    %50 = arith.truncf %47 : vector<48x128xf32> to vector<48x128xbf16>
    %c32_33 = arith.constant 32 : index
    %c0_34 = arith.constant 0 : index
    %51 = vector.load %arg7[%c32_33, %c0_34] : memref<112x128xbf16, #tpu.memory_space<vmem>>, vector<48x128xbf16>
    tpu.vector_store %arg7[%c32_33, %c0_34], %50 {strides = array<i32>} : memref<112x128xbf16, #tpu.memory_space<vmem>>, vector<48x128xbf16>,
    %c80 = arith.constant 80 : index
    %c0_35 = arith.constant 0 : index
    %52 = vector.load %arg7[%c80, %c0_35] : memref<112x128xbf16, #tpu.memory_space<vmem>>, vector<32x128xbf16>
    tpu.vector_store %arg7[%c80, %c0_35], %48 {strides = array<i32>} : memref<112x128xbf16, #tpu.memory_space<vmem>>, vector<32x128xbf16>,
    return
  }
  func.func @transform_0(%arg0: i32, %arg1: i32) -> (i32, i32) {
    %c0_i32 = arith.constant 0 : i32
    %c0_i32_0 = arith.constant 0 : i32
    return %arg1, %c0_i32 : i32, i32
  }
  func.func @transform_1(%arg0: i32, %arg1: i32) -> (i32, i32) {
    %c0_i32 = arith.constant 0 : i32
    %c0_i32_0 = arith.constant 0 : i32
    return %c0_i32, %arg0 : i32, i32
  }
  func.func @transform_2(%arg0: i32, %arg1: i32) -> (i32, i32) {
    %c0_i32 = arith.constant 0 : i32
    %c0_i32_0 = arith.constant 0 : i32
    return %c0_i32, %arg0 : i32, i32
  }
  func.func @transform_3(%arg0: i32, %arg1: i32) -> (i32, i32) {
    %c0_i32 = arith.constant 0 : i32
    %c0_i32_0 = arith.constant 0 : i32
    %c0_i32_1 = arith.constant 0 : i32
    return %c0_i32, %c0_i32_0 : i32, i32
  }
  func.func @transform_4(%arg0: i32, %arg1: i32) -> (i32, i32) {
    %c0_i32 = arith.constant 0 : i32
    %c0_i32_0 = arith.constant 0 : i32
    %c0_i32_1 = arith.constant 0 : i32
    return %c0_i32, %c0_i32_0 : i32, i32
  }
  func.func @transform_5(%arg0: i32, %arg1: i32) -> (i32, i32) {
    %c0_i32 = arith.constant 0 : i32
    return %arg1, %arg0 : i32, i32
  }
}

</mosaic_0001>

<bundles_post_ra>
// kernel: tpu_custom_call.1
= control target key start
LH: loop header
LB: loop body
LE: loop exit
PB: predicated region body
PF: predicated region fallthrough
CT: control target
= control target key end

     0   :  { %10 = vsyncpa [#allocation4], 0  ;;  %s3115_s0 = inlined_call_operand.vmem [shape: bf16[160,128], index: 0, kind: input, shape index: {}]   ;;  %s3116_s1 = inlined_call_operand.hbm [shape: bf16[1152,128], index: 1, kind: input, shape index: {}]   ;;  %s3117_s2 = inlined_call_operand.vmem [shape: f32[1,128], index: 2, kind: input, shape index: {}]   ;;  %s3118_s3 = inlined_call_operand.vmem [shape: f32[96,1], index: 3, kind: input, shape index: {}]   ;;  %s3119_s4 = inlined_call_operand.vmem [shape: f32[48,1], index: 4, kind: input, shape index: {}]   ;;  %s3120_s5 = inlined_call_operand.hbm [shape: bf16[112,128], index: 5, kind: output, shape index: {}]  }
   0x1   :  { %11 = vsyncpa [#allocation5], 0  ;;  %s2566_s18 = smov [#allocation3]   ;;  %s2518_s22 = scalar_lea.hbm %s3116_s1, 9216 }
   0x2   :  { %s19_s19 = sshll.u32 %s2566_s18, 4  ;;  %p2519_p0 = scmp.ne.s32.totalorder %s3116_s1, %s2518_s22  ;;  %s20_s19 = int_to_ptr.vmem [resolvable:$true] %s19_s19 }
   0x3   :  { %p2522_p1 = scmp.lt.u32.totalorder %s2518_s22, %s3116_s1 }
   0x5   :  { %p2524_p2 = pnand %p2522_p1, %p2519_p0 }
   0x7   :  { %2527 = shalt.err (!%p2524_p2)
}
   0x8   :  { %s2528_s27 = scalar_lea.vmem %s20_s19, 9216  ;;  %p2533_p4 = scmp.lt.s32.totalorder %s20_s19, %s20_s19 }
   0x9   :  { %p2529_p3 = scmp.ne.s32.totalorder %s20_s19, %s2528_s27  ;;  %p2534_p5 = scmp.lt.s32.totalorder %s2528_s27, %s2528_s27 }
   0xb   :  { %p2535_p6 = por %p2534_p5, %p2533_p4 }
   0xd   :  { %p2536_p7 = pnand %p2535_p6, %p2529_p3 }
   0xf   :  { %2539 = shalt.err (!%p2536_p7)
}
  0x10   :  { %s2567_s28 = smov 64   ;;  %s2568_s29 = smov 4  }
  0x11   :  { %25 = dma.hbm_to_vmem [thread:$0]  %s3116_s1, 9216, %s20_s19, [#allocation4], %s2567_s28, %s2567_s28, %s2568_s29  }
  0x12   :  { %2562 = dma.done.wait [#allocation4], 9216  }
  0x13   :  { %2563 = vsyncadd [#allocation4], 4294958080  ;;  %v2424_v0 = vld [vmem:[#allocation3 + $0x100] sm:$0xff]   ;;  %v2427_v3 = vld [vmem:[#allocation3 + $0x108] sm:$0xff]   ;;  %vm93_vm0 = vsmask.f32 3328 }
  0x14   :  { %v2425_v1 = vld [vmem:[#allocation3 + $0x140] sm:$0xff]   ;;  %2074 = vmatprep.subr.bf16.mxu0 %v2424_v0  ;;  %v2428_v4 = vld [vmem:[#allocation3 + $0x148] sm:$0xff]   ;;  %v2430_v6 = vld [vmem:[#allocation3 + $0x110] sm:$0xff]   ;;  %vm150_vm1 = vcmask 1042432   ;;  %vm281_vm2 = vsmask.f32 4352 }
  0x15   :  { %v2426_v2 = vld [vmem:[#allocation3 + $0xc0] sm:$0xff]   ;;  %2272 = vmatprep.subr.bf16.mxu1 %v2425_v1  ;;  %v2429_v5 = vld [vmem:[#allocation3 + $0xc8] sm:$0xff]   ;;  %v2431_v7 = vld [vmem:[#allocation3 + $0x150] sm:$0xff]  }
  0x16   :  { %2075 = vmatpush3.bf16.msra.mxu0 %v2426_v2  ;;  %2273 = vmatpush3.bf16.msra.mxu1 %v2425_v1  ;;  %v2432_v8 = vld [vmem:[#allocation3 + $0xd0] sm:$0xff]   ;;  %v2433_v9 = vld [vmem:[#allocation3 + $0x118] sm:$0xff]   ;;  %v2436_v12 = vld [vmem:[#allocation3 + $0x120] sm:$0xff]  }
  0x17   :  { %2076 = vmatprep.subr.bf16.mxu0 %v2427_v3  ;;  %2274 = vmatprep.subr.bf16.mxu1 %v2428_v4  ;;  %v2434_v10 = vld [vmem:[#allocation3 + $0x158] sm:$0xff]   ;;  %v2437_v13 = vld [vmem:[#allocation3 + $0x160] sm:$0xff]   ;;  %v2439_v15 = vld [vmem:[#allocation3 + $0x128] sm:$0xff]  }
  0x18   :  { %v2435_v11 = vld [vmem:[#allocation3 + $0xd8] sm:$0xff]   ;;  %v2438_v14 = vld [vmem:[#allocation3 + $0xe0] sm:$0xff]   ;;  %v2440_v16 = vld [vmem:[#allocation3 + $0x168] sm:$0xff]  }
  0x19   :  { %v2441_v17 = vld [vmem:[#allocation3 + $0xe8] sm:$0xff]   ;;  %v2442_v18 = vld [vmem:[#allocation3 + $0x130] sm:$0xff]   ;;  %v2445_v21 = vld [vmem:[#allocation3 + $0x138] sm:$0xff]  }
  0x1a   :  { %2077 = vmatpush3.bf16.msra.mxu0 %v2429_v5  ;;  %2275 = vmatpush3.bf16.msra.mxu1 %v2428_v4  ;;  %v2443_v19 = vld [vmem:[#allocation3 + $0x170] sm:$0xff]   ;;  %v39_v22 = vld [vmem:[%s3115_s0 + $0x10] sm:$0xf]  ;;  %v40_v23 = vld [vmem:[%s3115_s0 + $0x14] sm:$0xf] }
  0x1b   :  { %2078 = vmatprep.subr.bf16.mxu0 %v2430_v6  ;;  %2276 = vmatprep.subr.bf16.mxu1 %v2431_v7  ;;  %v2444_v20 = vld [vmem:[#allocation3 + $0xf0] sm:$0xff]   ;;  %v41_v24 = vld [vmem:[%s3115_s0 + $0x18] sm:$0xf]  ;;  %v2446_v25 = vld [vmem:[#allocation3 + $0x178] sm:$0xff]   ;;  %v1957_v27 = vcombine.low %v39_v22, %v40_v23 }
  0x1c   :  { %v2629_v26 = vld [vmem:[%s3115_s0 + $0x1c] sm:$0xf]  ;;  %v2634_v28 = vld [vmem:[%s3115_s0 + $0xc] sm:$0xf]  ;;  %v1951_v29 = vcombine.low %v40_v23, %v41_v24  ;;  %v2447_v30 = vld [vmem:[#allocation3 + $0xf8] sm:$0xff]  }
  0x1d   :  { %v1958_v31 = vcombine.low %v41_v24, %v2629_v26  ;;  %v1950_v32 = vcombine.low %v2634_v28, %v39_v22  ;;  %v103_v33 = vshrl.u32 %v1957_v27, 16  ;;  %v106_v34 = vshll.u32 %v1957_v27, 16  ;;  %v2453_v45 = vld [vmem:[#allocation3 + $0x40] sm:$0xff]   ;;  %v43_v51 = vld [vmem:[%s3115_s0 + $0x20] sm:$0xf] }
  0x1e   :  { %2079 = vmatpush3.bf16.msra.mxu0 %v2432_v8  ;;  %2277 = vmatpush3.bf16.msra.mxu1 %v2431_v7  ;;  %v291_v35 = vshrl.u32 %v1951_v29, 16  ;;  %v294_v36 = vshll.u32 %v1951_v29, 16  ;;  %v2454_v46 = vld [vmem:[#allocation3 + $0x1c0] sm:$0xff]   ;;  %v2643_v53 = vrot.slane %v1957_v27, 5  ;;  %v2650_v55 = vld [vmem:[%s3115_s0 + $0x24] sm:$0xf]  ;;  %v1952_v23 = vcombine.low %v2629_v26, %v43_v51 }
  0x1f   :  { %2080 = vmatprep.subr.bf16.mxu0 %v2433_v9  ;;  %2278 = vmatprep.subr.bf16.mxu1 %v2434_v10  ;;  %v112_v37 = vshrl.u32 %v1958_v31, 16  ;;  %v115_v38 = vshll.u32 %v1958_v31, 16  ;;  %v283_v39 = vshrl.u32 %v1950_v32, 16  ;;  %v286_v40 = vshll.u32 %v1950_v32, 16  ;;  %v2457_v29 = vld [vmem:[#allocation3 + $0x180] sm:$0xff]   ;;  %v2460_v32 = vld [vmem:[#allocation3 + $0x1c8] sm:$0xff]  }
  0x20   :  { %v105_v41 = vrot.slane %v103_v33, 4  ;;  %v108_v42 = vrot.slane %v106_v34, 5  ;;  %v293_v43 = vrot.slane %v291_v35, 3  ;;  %v296_v44 = vrot.slane %v294_v36, 4 }
  0x21   :  { %v114_v47 = vrot.slane %v112_v37, 4  ;;  %v117_v48 = vrot.slane %v115_v38, 5  ;;  %v285_v49 = vrot.slane %v283_v39, 3  ;;  %v288_v50 = vrot.slane %v286_v40, 4  ;;  %v2456_v39 = vld [vmem:[#allocation3] sm:$0xff]   ;;  %v2458_v40 = vld [vmem:[#allocation3 + $0x48] sm:$0xff]  }
  0x22   :  { %2081 = vmatpush3.bf16.msra.mxu0 %v2435_v11  ;;  %2279 = vmatpush3.bf16.msra.mxu1 %v2434_v10  ;;  %v2641_v52 = vor.u32 %v108_v42, %v105_v41  ;;  %v2645_v54 = vrot.slane %v1958_v31, 5  ;;  %v2654_v57 = vor.u32 %v296_v44, %v293_v43  ;;  %v2657_v58 = vcombine.low %v43_v51, %v2650_v55  ;;  %v2461_v42 = vld [vmem:[#allocation3 + $0x188] sm:$0xff]   ;;  %v2468_v51 = vld [vmem:[#allocation3 + $0x190] sm:$0xff]  }
  0x23   :  { %2082 = vmatprep.subr.bf16.mxu0 %v2436_v12  ;;  %2280 = vmatprep.subr.bf16.mxu1 %v2437_v13  ;;  %v2652_v56 = vor.u32 %v117_v48, %v114_v47  ;;  %v317_v62 = vshrl.u32 %v2643_v53, 16  ;;  %v2668_v0 = vor.u32 %v288_v50, %v285_v49  ;;  %v320_v1 = vshll.u32 %v2643_v53, 16  ;;  %v2459_v48 = vld [vmem:[#allocation3 + $0x8] sm:$0xff]  }
  0x24   :  { %v300_v59 = vshrl.u32 %v2641_v52, 16  ;;  %v303_v60 = vshll.u32 %v2641_v52, 16  ;;  %v155_v61 = vsel %vm150_vm1, %v2643_v53, %v2645_v54  ;;  %v334_v34 = vshrl.u32 %v1952_v23, 16 }
  0x25   :  { %v119_v63 = vsel %vm93_vm0, %v2641_v52, %v2652_v56  ;;  %v325_v2 = vshrl.u32 %v155_v61, 16  ;;  %v319_v7 = vrot.slane %v317_v62, 3  ;;  %v322_v8 = vrot.slane %v320_v1, 4  ;;  %v45_v62 = vld [vmem:[%s3115_s0 + $0x28] sm:$0xf] }
  0x26   :  { %2083 = vmatpush3.bf16.msra.mxu0 %v2438_v14  ;;  %2281 = vmatpush3.bf16.msra.mxu1 %v2437_v13  ;;  %v302_v3 = vrot.slane %v300_v59, 3  ;;  %v305_v4 = vrot.slane %v303_v60, 4  ;;  %v308_v5 = vshrl.u32 %v119_v63, 16  ;;  %v311_v6 = vshll.u32 %v119_v63, 16  ;;  %v2674_v14 = vld [vmem:[%s3115_s0 + $0x8] sm:$0xf] }
  0x27   :  { %2084 = vmatprep.subr.bf16.mxu0 %v2439_v15  ;;  %2282 = vmatprep.subr.bf16.mxu1 %v2440_v16  ;;  %v327_v9 = vrot.slane %v325_v2, 3  ;;  %v328_v10 = vshll.u32 %v155_v61, 16  ;;  %v156_v15 = vrot.slane %v2657_v58, 5  ;;  %v337_v35 = vshll.u32 %v1952_v23, 16  ;;  %v2463_v61 = vld [vmem:[#allocation3 + $0x50] sm:$0xff]  }
  0x28   :  { %v306_v11 = vor.u32 %v305_v4, %v302_v3  ;;  %v310_v12 = vrot.slane %v308_v5, 3  ;;  %v313_v13 = vrot.slane %v311_v6, 4  ;;  %v2697_v36 = vcombine.low %v2674_v14, %v2634_v28  ;;  %v46_v63 = vld [vmem:[%s3115_s0 + $0x2c] sm:$0xf]  ;;  %v47_v1 = vld [vmem:[%s3115_s0 + $0x30] sm:$0xf] }
  0x29   :  { %v157_v22 = vsel %vm150_vm1, %v2645_v54, %v156_v15  ;;  %v336_v43 = vrot.slane %v334_v34, 3  ;;  %v339_v44 = vrot.slane %v337_v35, 4  ;;  %v1960_v4 = vcombine.low %v45_v62, %v46_v63  ;;  %v2731_v6 = vld [vmem:[%s3115_s0 + $0x34] sm:$0xf] }
  0x2a   :  { %2085 = vmatpush3.bf16.msra.mxu0 %v2441_v17  ;;  %2283 = vmatpush3.bf16.msra.mxu1 %v2440_v16  ;;  %v323_v16 = vor.u32 %v322_v8, %v319_v7  ;;  %v330_v17 = vrot.slane %v328_v10, 4  ;;  %v355_v27 = vshll.u32 %v157_v22, 16  ;;  %v95_v59 = vshrl.u32 %v2697_v36, 16 }
  0x2b   :  { %2086 = vmatprep.subr.bf16.mxu0 %v2442_v18  ;;  %2284 = vmatprep.subr.bf16.mxu1 %v2443_v19  ;;  %v121_v18 = vshrl.u32 %v2657_v58, 16  ;;  %v2716_v60 = vor.u32 %v339_v44, %v336_v43  ;;  %v1953_v5 = vcombine.low %v2650_v55, %v45_v62  ;;  %v1961_v7 = vcombine.low %v47_v1, %v2731_v6  ;;  %v2760_v43 = vld [vmem:[%s3115_s0 + $0x38] sm:$0xf] }
  0x2c   :  { %v2691_v24 = vor.u32 %v330_v17, %v327_v9  ;;  %v357_v38 = vrot.slane %v355_v27, 4  ;;  %v2464_v9 = vld [vmem:[#allocation3 + $0x10] sm:$0xff]   ;;  %v130_v10 = vshrl.u32 %v1960_v4, 16 }
  0x2d   :  { %v361_v55 = vshrl.u32 %v1953_v5, 16  ;;  %v2741_v17 = vrot.slane %v1961_v7, 5 }
  0x2e   :  { %2087 = vmatpush3.bf16.msra.mxu0 %v2444_v20  ;;  %2285 = vmatpush3.bf16.msra.mxu1 %v2443_v19  ;;  %v124_v19 = vshll.u32 %v2657_v58, 16  ;;  %v2679_v20 = vor.u32 %v313_v13, %v310_v12  ;;  %v332_v26 = vsel %vm281_vm2, %v323_v16, %v2691_v24  ;;  %v158_v12 = vrot.slane %v1960_v4, 5 }
  0x2f   :  { %2088 = vmatprep.subr.bf16.mxu0 %v2445_v21  ;;  %2286 = vmatprep.subr.bf16.mxu1 %v2446_v25  ;;  %v2684_v21 = vsel %vm281_vm2, %v2668_v0, %v2654_v57  ;;  %v2739_v13 = vsel %vm281_vm2, %v2654_v57, %v2716_v60  ;;  %v364_v16 = vshll.u32 %v1953_v5, 16  ;;  %v2465_v57 = vld [vmem:[#allocation3 + $0x58] sm:$0xff]   ;;  %v2476_v5 = vld [vmem:[#allocation3 + $0x68] sm:$0xff]  }
  0x30   :  { %v315_v31 = vsel %vm281_vm2, %v306_v11, %v2679_v20  ;;  %v126_v33 = vrot.slane %v124_v19, 5  ;;  %2288 = vmatprep.mubr.bf16.mxu1 %v332_v26  ;;  %v133_v11 = vshll.u32 %v1960_v4, 16  ;;  %v161_v34 = vsel %vm150_vm1, %v158_v12, %v2741_v17 }
  0x31   :  { %662 = vmatprep.mubr.bf16.mxu0 %v315_v31  ;;  %v366_v31 = vrot.slane %v364_v16, 4  ;;  %v406_v26 = vshrl.u32 %v161_v34, 16 }
  0x32   :  { %2089 = vmatpush3.bf16.msra.mxu0 %v2447_v30  ;;  %2287 = vmatpush3.bf16.msra.mxu1 %v2446_v25  ;;  %v352_v25 = vshrl.u32 %v157_v22, 16  ;;  %v123_v30 = vrot.slane %v121_v18, 4  ;;  %v2474_v18 = vld [vmem:[#allocation3 + $0x1d8] sm:$0xff]   ;;  %v132_v22 = vrot.slane %v130_v10, 4  ;;  %v135_v23 = vrot.slane %v133_v11, 5 }
  0x33   :  { %2140 = vmatprep.subr.bf16.mxu1 %v2453_v45  ;;  %2206 = vmatprep.subr.bf16.mxu0 %v2454_v46  ;;  %v2466_v46 = vld [vmem:[#allocation3 + $0x1d0] sm:$0xff]  }
  0x34   :  { %v354_v37 = vrot.slane %v352_v25, 3  ;;  %v2702_v41 = vor.u32 %v126_v33, %v123_v30  ;;  %v159_v25 = vsel %vm150_vm1, %v156_v15, %v158_v12  ;;  %v363_v30 = vrot.slane %v361_v55, 3 }
  0x35   :  { %663 = vmatmul.mubr.bf16.vlgmr.msra.gmra.mrb[0].mxu0 %v2684_v21  ;;  %v379_v27 = vshrl.u32 %v159_v25, 16  ;;  %v136_v33 = vor.u32 %v135_v23, %v132_v22  ;;  %v1954_v15 = vcombine.low %v46_v63, %v47_v1  ;;  %v2770_v1 = vld [vmem:[%s3115_s0 + $0x40] sm:$0xf]  ;;  %v2483_v23 = vld [vmem:[#allocation3 + $0x1e0] sm:$0xff]  }
  0x36   :  { %v2704_v45 = vor.u32 %v357_v38, %v354_v37  ;;  %2207 = vmatpush3.bf16.msra.mxu0 %v2457_v29  ;;  %v128_v28 = vsel %vm93_vm0, %v2652_v56, %v2702_v41  ;;  %v382_v29 = vshll.u32 %v159_v25, 16  ;;  %v2467_v37 = vld [vmem:[#allocation3 + $0x18] sm:$0xff]   ;;  %v1966_v22 = vcombine.low %v2770_v1, %v2770_v1 }
  0x37   :  { %2208 = vmatprep.subr.bf16.mxu0 %v2460_v32  ;;  %v343_v49 = vshrl.u32 %v128_v28, 16  ;;  %v346_v50 = vshll.u32 %v128_v28, 16  ;;  %v2475_v32 = vld [vmem:[#allocation3 + $0x198] sm:$0xff]   ;;  %v381_v35 = vrot.slane %v379_v27, 3  ;;  %v137_v38 = vsel %vm93_vm0, %v2702_v41, %v136_v33 }
  0x38   :  { %v2712_v47 = vsel %vm281_vm2, %v2691_v24, %v2704_v45  ;;  %v384_v58 = vrot.slane %v382_v29, 4  ;;  %v370_v44 = vshrl.u32 %v137_v38, 16  ;;  %v373_v28 = vshll.u32 %v137_v38, 16 }
  0x39   :  { %2289 = vmatmul.mubr.bf16.vlgmr.msra.gmra.mrb[0].mxu1 %v2712_v47  ;;  %v345_v2 = vrot.slane %v343_v49, 3  ;;  %v348_v3 = vrot.slane %v346_v50, 4  ;;  %v2472_v49 = vld [vmem:[#allocation3 + $0x60] sm:$0xff]   ;;  %v408_v41 = vrot.slane %v406_v26, 3  ;;  %v388_v11 = vshrl.u32 %v1954_v15, 16 }
  0x3a   :  { %2141 = vmatpush3.bf16.msra.mxu1 %v2456_v39  ;;  %2209 = vmatpush3.bf16.msra.mxu0 %v2461_v42  ;;  %v409_v39 = vshll.u32 %v161_v34, 16  ;;  %v142_v42 = vshll.u32 %v1961_v7, 16  ;;  %v2765_v50 = vld [vmem:[%s3115_s0 + $0x3c] sm:$0xf]  ;;  %v391_v12 = vshll.u32 %v1954_v15, 16  ;;  %v231_v15 = vrot.slane %v1966_v22, 5 }
  0x3b   :  { %2142 = vmatprep.subr.bf16.mxu1 %v2458_v40  ;;  %2210 = vmatprep.subr.bf16.mxu0 %v2466_v46  ;;  %v2734_v8 = vor.u32 %v348_v3, %v345_v2  ;;  %v139_v40 = vshrl.u32 %v1961_v7, 16  ;;  %v385_v46 = vor.u32 %v384_v58, %v381_v35  ;;  %v372_v2 = vrot.slane %v370_v44, 3 }
  0x3c   :  { %v144_v63 = vrot.slane %v142_v42, 5  ;;  %v375_v3 = vrot.slane %v373_v28, 4  ;;  %v2778_v7 = vcombine.low %v2760_v43, %v2765_v50  ;;  %v390_v29 = vrot.slane %v388_v11, 3 }
  0x3d   :  { %v2746_v19 = vsel %vm281_vm2, %v2679_v20, %v2734_v8  ;;  %v141_v62 = vrot.slane %v139_v40, 4  ;;  %v2774_v4 = vsel %vm281_vm2, %v2704_v45, %v385_v46  ;;  %v1963_v40 = vcombine.low %v2731_v6, %v2760_v43 }
  0x3e   :  { %2143 = vmatpush3.bf16.msra.mxu1 %v2459_v48  ;;  %2211 = vmatpush3.bf16.msra.mxu0 %v2468_v51  ;;  %v367_v48 = vor.u32 %v366_v31, %v363_v30  ;;  %v411_v51 = vrot.slane %v409_v39, 4  ;;  %v376_v55 = vor.u32 %v375_v3, %v372_v2  ;;  %v393_v30 = vrot.slane %v391_v12, 4  ;;  %v2486_v2 = vld [vmem:[#allocation3 + $0x78] sm:$0xff]  }
  0x3f   :  { %670 = vmatprep.mubr.bf16.mxu0 %v2746_v19  ;;  %2144 = vmatprep.subr.bf16.mxu1 %v2463_v61  ;;  %v2473_v61 = vld [vmem:[#allocation3 + $0x20] sm:$0xff]   ;;  %v2783_v10 = vor.u32 %v144_v63, %v141_v62  ;;  %v2816_v42 = vcombine.low %v2765_v50, %v2765_v50  ;;  %v218_v3 = vshrl.u32 %v2778_v7, 16  ;;  %v97_v12 = vrot.slane %v95_v59, 4  ;;  %v2487_v59 = vld [vmem:[#allocation3 + $0x38] sm:$0xff]  }
  0x40   :  { %671 = vmatmul.mubr.bf16.gmra.mrb[4].mxu0 %v2739_v13  ;;  %2212 = vmatprep.subr.bf16.mxu0 %v2474_v18  ;;  %v2787_v16 = vsel %vm281_vm2, %v2716_v60, %v367_v48  ;;  %v2790_v18 = vrot.slane %v2778_v7, 5  ;;  %v2485_v60 = vld [vmem:[#allocation3 + $0x1a0] sm:$0xff]   ;;  %v2802_v31 = vsel %vm281_vm2, %v2734_v8, %v376_v55  ;;  %v2809_v26 = vor.u32 %v393_v30, %v390_v29 }
  0x41   :  { %2292 = vmatprep.mubr.bf16.mxu1 %v2774_v4  ;;  %v146_v27 = vsel %vm93_vm0, %v136_v33, %v2783_v10  ;;  %678 = vmatprep.mubr.bf16.mxu0 %v2802_v31  ;;  %v98_v22 = vshll.u32 %v2697_v36, 16 }
  0x42   :  { %2145 = vmatpush3.bf16.msra.mxu1 %v2464_v9  ;;  %2213 = vmatpush3.bf16.msra.mxu0 %v2475_v32  ;;  %v2781_v9 = vor.u32 %v411_v51, %v408_v41  ;;  %v397_v32 = vshrl.u32 %v146_v27, 16  ;;  %v400_v34 = vshll.u32 %v146_v27, 16  ;;  %v230_v35 = vsel %vm150_vm1, %v2741_v17, %v2790_v18  ;;  %v2484_v41 = vld [vmem:[#allocation3 + $0x30] sm:$0xff]   ;;  %v2488_v51 = vld [vmem:[#allocation3 + $0x1e8] sm:$0xff]  }
  0x43   :  { %2146 = vmatprep.subr.bf16.mxu1 %v2465_v57  ;;  %v2477_v57 = vld [vmem:[#allocation3 + $0x28] sm:$0xff]   ;;  %2214 = vmatprep.subr.bf16.mxu0 %v2483_v23  ;;  %v433_v33 = vshrl.u32 %v230_v35, 16  ;;  %v436_v58 = vshll.u32 %v230_v35, 16  ;;  %v2492_v23 = vld [vmem:[#allocation3 + $0x1f0] sm:$0xff]   ;;  %v415_v35 = vshrl.u32 %v1963_v40, 16 }
  0x44   :  { %v2796_v25 = vsel %vm281_vm2, %v385_v46, %v2781_v9  ;;  %v399_v38 = vrot.slane %v397_v32, 3  ;;  %v402_v39 = vrot.slane %v400_v34, 4  ;;  %v2820_v46 = vsel %vm281_vm2, %v367_v48, %v2809_v26 }
  0x45   :  { %2293 = vmatmul.mubr.bf16.gmra.mrb[4].mxu1 %v2796_v25  ;;  %v435_v44 = vrot.slane %v433_v33, 3  ;;  %v438_v28 = vrot.slane %v436_v58, 4  ;;  %v221_v48 = vshll.u32 %v2778_v7, 16  ;;  %v100_v34 = vrot.slane %v98_v22, 5  ;;  %v2495_v33 = vld [vmem:[#allocation3 + $0x1f8] sm:$0xff]  }
  0x46   :  { %2147 = vmatpush3.bf16.msra.mxu1 %v2467_v37  ;;  %v2482_v37 = vld [vmem:[#allocation3 + $0x70] sm:$0xff]   ;;  %2215 = vmatpush3.bf16.msra.mxu0 %v2485_v60  ;;  %v220_v60 = vrot.slane %v218_v3, 4 }
  0x47   :  { %2148 = vmatprep.subr.bf16.mxu1 %v2472_v49  ;;  %v232_v49 = vsel %vm150_vm1, %v2790_v18, %v231_v15  ;;  %v2827_v11 = vor.u32 %v438_v28, %v435_v44  ;;  %2216 = vmatprep.subr.bf16.mxu0 %v2488_v51  ;;  %v223_v32 = vrot.slane %v221_v48, 5  ;;  %v418_v15 = vshll.u32 %v1963_v40, 16 }
  0x48   :  { %679 = vmatmul.mubr.bf16.gmra.mrb[8].mxu0 %v2787_v16  ;;  %v460_v62 = vshrl.u32 %v232_v49, 16  ;;  %v463_v63 = vshll.u32 %v232_v49, 16  ;;  %v101_v44 = vor.u32 %v100_v34, %v97_v12  ;;  %v417_v28 = vrot.slane %v415_v35, 3 }
  0x49   :  { %v2841_v7 = vsel %vm281_vm2, %v2781_v9, %v2827_v11  ;;  %v445_v49 = vshll.u32 %v2816_v42, 16 }
  0x4a   :  { %2149 = vmatpush3.bf16.msra.mxu1 %v2473_v61  ;;  %v2824_v61 = vor.u32 %v402_v39, %v399_v38  ;;  %v462_v29 = vrot.slane %v460_v62, 3  ;;  %v465_v30 = vrot.slane %v463_v63, 4  ;;  %2296 = vmatprep.mubr.bf16.mxu1 %v2841_v7  ;;  %v442_v38 = vshrl.u32 %v2816_v42, 16 }
  0x4b   :  { %2150 = vmatprep.subr.bf16.mxu1 %v2476_v5  ;;  %v2489_v5 = vld [vmem:[#allocation3 + $0x1a8] sm:$0xff]   ;;  %v2849_v39 = vor.u32 %v223_v32, %v220_v60  ;;  %v420_v62 = vrot.slane %v418_v15, 4  ;;  %v110_v3 = vsel %vm93_vm0, %v101_v44, %v2641_v52  ;;  %v805_v42 = vshll.u32 %v101_v44, 16  ;;  %v2497_v32 = vld [vmem:[#allocation3 + $0x80] sm:$0xff]  }
  0x4c   :  { %v2835_v27 = vsel %vm281_vm2, %v376_v55, %v2824_v61  ;;  %2217 = vmatpush3.bf16.msra.mxu0 %v2489_v5  ;;  %v36_v55 = vld [vmem:[%s3115_s0 + $0x4] sm:$0x8]  ;;  %v466_v58 = vor.u32 %v465_v30, %v462_v29  ;;  %v802_v5 = vshrl.u32 %v101_v44, 16  ;;  %v810_v22 = vshrl.u32 %v110_v3, 16 }
  0x4d   :  { %686 = vmatprep.mubr.bf16.mxu0 %v2835_v27  ;;  %2218 = vmatprep.subr.bf16.mxu0 %v2492_v23  ;;  %v813_v23 = vshll.u32 %v110_v3, 16  ;;  %v807_v29 = vrot.slane %v805_v42, 4  ;;  %v2860_v30 = vor.u32 %v420_v62, %v417_v28  ;;  %v454_v44 = vshll.u32 %v2849_v39, 16 }
  0x4e   :  { %2151 = vmatpush3.bf16.msra.mxu1 %v2477_v57  ;;  %v2493_v57 = vld [vmem:[#allocation3 + $0x1b0] sm:$0xff]   ;;  %v467_v51 = vsel %vm281_vm2, %v2827_v11, %v466_v58  ;;  %v444_v28 = vrot.slane %v442_v38, 3  ;;  %v1248_v3 = vshrl.u32 %v2652_v56, 16 }
  0x4f   :  { %2152 = vmatprep.subr.bf16.mxu1 %v2482_v37  ;;  %v1949_v37 = vcombine.low %v36_v55, %v2674_v14  ;;  %v2496_v14 = vld [vmem:[#allocation3 + $0x1b8] sm:$0xff]   ;;  %2297 = vmatmul.mubr.bf16.gmra.mrb[8].mxu1 %v467_v51  ;;  %v812_v55 = vrot.slane %v810_v22, 3  ;;  %v815_v58 = vrot.slane %v813_v23, 4  ;;  %v2498_v51 = vld [vmem:[#allocation3 + $0x200] sm:$0xff]  }
  0x50   :  { %687 = vmatmul.mubr.bf16.gmra.mrb[12].mxu0 %v2820_v46 }
  0x51   :  { %v793_v40 = vshrl.u32 %v1949_v37, 16  ;;  %v796_v63 = vshll.u32 %v1949_v37, 16  ;;  %2219 = vmatpush3.bf16.msra.mxu0 %v2493_v57  ;;  %v2865_v57 = vsel %vm281_vm2, %v2809_v26, %v2860_v30  ;;  %v816_v37 = vor.u32 %v815_v58, %v812_v55  ;;  %v2504_v58 = vld [vmem:[#allocation3 + $0xa0] sm:$0xff]  }
  0x52   :  { %2153 = vmatpush3.bf16.msra.mxu1 %v2484_v41  ;;  %v225_v41 = vsel %vm93_vm0, %v2783_v10, %v2849_v39  ;;  %2220 = vmatprep.subr.bf16.mxu0 %v2495_v33  ;;  %v451_v33 = vshrl.u32 %v2849_v39, 16  ;;  %v2902_v55 = vrot.slane %v2697_v36, 5  ;;  %v2500_v36 = vld [vmem:[#allocation3 + $0x208] sm:$0xff]  }
  0x53   :  { %2154 = vmatprep.subr.bf16.mxu1 %v2486_v2  ;;  %v424_v48 = vshrl.u32 %v225_v41, 16  ;;  %v427_v12 = vshll.u32 %v225_v41, 16  ;;  %v804_v2 = vrot.slane %v802_v5, 3  ;;  %v795_v60 = vrot.slane %v793_v40, 3 }
  0x54   :  { %v798_v15 = vrot.slane %v796_v63, 4  ;;  %v453_v40 = vrot.slane %v451_v33, 3  ;;  %v447_v41 = vrot.slane %v445_v49, 4  ;;  %v456_v5 = vrot.slane %v454_v44, 4 }
  0x55   :  { %v426_v34 = vrot.slane %v424_v48, 3  ;;  %v429_v35 = vrot.slane %v427_v12, 4  ;;  %v808_v52 = vor.u32 %v807_v29, %v804_v2  ;;  %2221 = vmatpush3.bf16.msra.mxu0 %v2496_v14  ;;  %v835_v42 = vsel %vm281_vm2, %v816_v37, %v2679_v20  ;;  %v2499_v48 = vld [vmem:[#allocation3 + $0x88] sm:$0xff]   ;;  %v2501_v29 = vld [vmem:[#allocation3 + $0x90] sm:$0xff]  }
  0x56   :  { %2155 = vmatpush3.bf16.msra.mxu1 %v2487_v59  ;;  %v799_v62 = vor.u32 %v798_v15, %v795_v60  ;;  %2328 = vmatprep.subr.bf16.mxu0 %v2498_v51  ;;  %v1250_v49 = vrot.slane %v1248_v3, 3  ;;  %v1251_v12 = vshll.u32 %v2652_v56, 16  ;;  %v457_v22 = vor.u32 %v456_v5, %v453_v40 }
  0x57   :  { %2300 = vmatprep.subr.bf16.mxu1 %v2497_v32  ;;  %v2868_v59 = vor.u32 %v429_v35, %v426_v34  ;;  %v817_v14 = vsel %vm281_vm2, %v808_v52, %v816_v37  ;;  %v448_v23 = vor.u32 %v447_v41, %v444_v28  ;;  %v2502_v35 = vld [vmem:[#allocation3 + $0x98] sm:$0xff]   ;;  %v847_v40 = vshrl.u32 %v2783_v10, 16 }
  0x58   :  { %1048 = vmatprep.mubr.bf16.mxu1 %v817_v14  ;;  %v800_v38 = vsel %vm281_vm2, %v799_v62, %v2668_v0  ;;  %v1253_v2 = vrot.slane %v1251_v12, 4  ;;  %v2890_v0 = vld [vmem:[%s3115_s0 + $0x44] sm:$0xf]  ;;  %v850_v41 = vshll.u32 %v2783_v10, 16  ;;  %v1962_v3 = vcombine.low %v2760_v43, %v2760_v43 }
  0x59   :  { %v2875_v63 = vsel %vm281_vm2, %v2824_v61, %v2868_v59  ;;  %1049 = vmatmul.mubr.bf16.vlgmr.msra.gmra.mrb[12].mxu1 %v800_v38  ;;  %v458_v20 = vsel %vm281_vm2, %v2868_v59, %v457_v22  ;;  %v449_v56 = vsel %vm281_vm2, %v2860_v30, %v448_v23  ;;  %v2898_v34 = vcombine.low %v2770_v1, %v2890_v0 }
  0x5a   :  { %694 = vmatprep.mubr.bf16.mxu0 %v2875_v63  ;;  %1056 = vmatprep.mubr.bf16.mxu1 %v835_v42  ;;  %v1254_v60 = vor.u32 %v1253_v2, %v1250_v49  ;;  %v1955_v5 = vcombine.low %v2731_v6, %v2731_v6  ;;  %v849_v43 = vrot.slane %v847_v40, 3  ;;  %v162_v42 = vrot.slane %v1962_v3, 5  ;;  %v2508_v49 = vld [vmem:[#allocation3 + $0xb0] sm:$0xff]  }
  0x5b   :  { %695 = vmatmul.mubr.bf16.gmra.mrb[16].mxu0 %v2865_v57  ;;  %2301 = vmatpush3.bf16.msra.mxu1 %v2497_v32  ;;  %v1184_v33 = vshrl.u32 %v2898_v34, 16  ;;  %v1187_v37 = vshll.u32 %v2898_v34, 16  ;;  %v2569_v22 = vmov 0  }
  0x5c   :  { %2302 = vmatprep.subr.bf16.mxu1 %v2499_v48  ;;  %702 = vmatprep.mubr.bf16.mxu0 %v458_v20  ;;  %v1255_v32 = vsel %vm281_vm2, %v1254_v60, %v2734_v8  ;;  %v153_v8 = vsel %vm150_vm1, %v2902_v55, %v2643_v53  ;;  %v2506_v53 = vld [vmem:[#allocation3 + $0xa8] sm:$0xff]   ;;  %v163_v38 = vsel %vm150_vm1, %v2741_v17, %v162_v42  ;;  %v841_v23 = vshll.u32 %v1955_v5, 16  ;;  %v2510_v20 = vld [vmem:[#allocation3 + $0xb8] sm:$0xff]  }
  0x5d   :  { %v827_v52 = vshrl.u32 %v153_v8, 16  ;;  %v830_v15 = vshll.u32 %v153_v8, 16  ;;  %v1186_v28 = vrot.slane %v1184_v33, 4  ;;  %v1189_v62 = vrot.slane %v1187_v37, 5  ;;  %2423 = vset.pattern.permute.xlu1 %v2569_v22  ;;  %1894 = vst [vmem:[#allocation6] sm:$0xf] %v2569_v22  ;;  %2422 = vset.pattern.permute.xlu0 %v2569_v22 }
  0x5e   :  { %v856_v12 = vshrl.u32 %v163_v38, 16  ;;  %1895 = vst [vmem:[#allocation6 + $0x4] sm:$0xf] %v2569_v22  ;;  %1896 = vst [vmem:[#allocation6 + $0x8] sm:$0xf] %v2569_v22  ;;  %v859_v2 = vshll.u32 %v163_v38, 16 }
  0x5f   :  { %2303 = vmatpush3.bf16.msra.mxu1 %v2499_v48  ;;  %v832_v44 = vrot.slane %v830_v15, 4  ;;  %v2927_v10 = vor.u32 %v1189_v62, %v1186_v28  ;;  %v1195_v48 = vrot.slane %v2898_v34, 5  ;;  %1897 = vst [vmem:[#allocation6 + $0xc] sm:$0xf] %v2569_v22  ;;  %1928 = vst [vmem:[#allocation6 + $0x28] sm:$0xf] %v2569_v22 }
  0x60   :  { %2304 = vmatprep.subr.bf16.mxu1 %v2501_v29  ;;  %1929 = vst [vmem:[#allocation6 + $0x2c] sm:$0xf] %v2569_v22  ;;  %1930 = vst [vmem:[#allocation6 + $0x30] sm:$0xf] %v2569_v22  ;;  %v858_v60 = vrot.slane %v856_v12, 3  ;;  %v1676_v37 = vld [vmem:[%s3118_s3] sm:$0xff] }
  0x61   :  { %1057 = vmatmul.mubr.bf16.gmra.mrb[16].mxu1 %v2684_v21  ;;  %v829_v21 = vrot.slane %v827_v52, 3  ;;  %v1191_v6 = vsel %vm93_vm0, %v2849_v39, %v2927_v10  ;;  %1931 = vst [vmem:[#allocation6 + $0x34] sm:$0xf] %v2569_v22  ;;  %v1196_v39 = vsel %vm150_vm1, %v2790_v18, %v1195_v48  ;;  %v861_v52 = vrot.slane %v859_v2, 4  ;;  %1690 = vperm.xlu0 %2422, %v1676_v37  }
  0x62   :  { %1064 = vmatprep.mubr.bf16.mxu1 %v2746_v19  ;;  %v1275_v18 = vshrl.u32 %v1191_v6, 16  ;;  %v1278_v8 = vshll.u32 %v1191_v6, 16  ;;  %v1305_v42 = vshll.u32 %v2927_v10, 16  ;;  %v2016_v6 = vcombine.low %v2890_v0, %v2890_v0  ;;  %v1683_v0 = vld [vmem:[%s3118_s3 + $0x38] sm:$0xff] }
  0x63   :  { %703 = vmatmul.mubr.bf16.gmra.mrb[20].mxu0 %v449_v56  ;;  %2305 = vmatpush3.bf16.msra.mxu1 %v2501_v29  ;;  %v2910_v19 = vor.u32 %v832_v44, %v829_v21  ;;  %v819_v29 = vshrl.u32 %v2902_v55, 16  ;;  %v1284_v56 = vshrl.u32 %v1196_v39, 16  ;;  %v862_v44 = vor.u32 %v861_v52, %v858_v60  ;;  %v1685_v60 = vld [vmem:[%s3118_s3 + $0x48] sm:$0xff] }
  0x64   :  { %1503 = vmatprep.mubr.bf16.mxu0 %v1255_v32  ;;  %2306 = vmatprep.subr.bf16.mxu1 %v2502_v35  ;;  %v1287_v32 = vshll.u32 %v1196_v39, 16  ;;  %v1277_v40 = vrot.slane %v1275_v18, 3  ;;  %v1296_v2 = vshll.u32 %v2016_v6, 16  ;;  %v1684_v18 = vld [vmem:[%s3118_s3 + $0x40] sm:$0xff] }
  0x65   :  { %v2922_v14 = vsel %vm281_vm2, %v2910_v19, %v2691_v24  ;;  %v2505_v24 = vld [vmem:[#allocation3 + $0x218] sm:$0xff]   ;;  %v1286_v15 = vrot.slane %v1284_v56, 3  ;;  %v821_v28 = vrot.slane %v819_v29, 3  ;;  %v2959_v3 = vsel %vm281_vm2, %v2781_v9, %v862_v44 }
  0x66   :  { %v1289_v33 = vrot.slane %v1287_v32, 4  ;;  %v1260_v29 = vshll.u32 %v2645_v54, 16  ;;  %v1854_v44 = vld [vmem:[%s3119_s4 + $0x10] sm:$0xff] }
  0x67   :  { %2307 = vmatpush3.bf16.msra.mxu1 %v2502_v35  ;;  %v2509_v35 = vld [vmem:[#allocation3 + $0x220] sm:$0xff]  }
  0x68   :  { %2308 = vmatprep.subr.bf16.mxu1 %v2504_v58  ;;  %v2955_v62 = vor.u32 %v1289_v33, %v1286_v15  ;;  %v1686_v15 = vld [vmem:[%s3118_s3 + $0x50] sm:$0xff] }
  0x69   :  { %1065 = vmatmul.mubr.bf16.gmra.mrb[20].mxu1 %v2739_v13 }
  0x6a   :  { %1072 = vmatprep.mubr.bf16.mxu1 %v2802_v31 }
  0x6b   :  { %1504 = vmatmul.mubr.bf16.vlgmr.msra.gmra.mrb[24].mxu0 %v2739_v13  ;;  %v2503_v13 = vld [vmem:[#allocation3 + $0x210] sm:$0xff]   ;;  %2309 = vmatpush3.bf16.msra.mxu1 %v2504_v58  ;;  %v822_v58 = vshll.u32 %v2902_v55, 16 }
  0x6c   :  { %2329 = vmatpush3.bf16.msra.mxu0 %v2498_v51  ;;  %1511 = vmatprep.mubr.bf16.mxu0 %v2802_v31  ;;  %v852_v51 = vrot.slane %v850_v41, 4  ;;  %v838_v31 = vshrl.u32 %v1955_v5, 16  ;;  %v1280_v41 = vrot.slane %v1278_v8, 4 }
  0x6d   :  { %2330 = vmatprep.subr.bf16.mxu0 %v2500_v36  ;;  %2310 = vmatprep.subr.bf16.mxu1 %v2506_v53 }
  0x6e   :  { %v853_v17 = vor.u32 %v852_v51, %v849_v43  ;;  %v840_v21 = vrot.slane %v838_v31, 3  ;;  %v1677_v43 = vld [vmem:[%s3118_s3 + $0x8] sm:$0xff]  ;;  %v1281_v51 = vor.u32 %v1280_v41, %v1277_v40 }
  0x6f   :  { %2311 = vmatpush3.bf16.msra.mxu1 %v2506_v53  ;;  %v824_v53 = vrot.slane %v822_v58, 4  ;;  %1695 = vperm.xlu0 %2422, %v1677_v43   ;;  %v1262_v58 = vrot.slane %v1260_v29, 4 }
  0x70   :  { %2331 = vmatpush3.bf16.msra.mxu0 %v2500_v36  ;;  %2312 = vmatprep.subr.bf16.mxu1 %v2508_v49  ;;  %v854_v55 = vsel %vm281_vm2, %v2824_v61, %v853_v17  ;;  %v843_v36 = vrot.slane %v841_v23, 4  ;;  %v1679_v61 = vld [vmem:[%s3118_s3 + $0x18] sm:$0xff]  ;;  %v1307_v17 = vrot.slane %v1305_v42, 4  ;;  %v2515_v23 = vld [vmem:[#allocation3 + $0x238] sm:$0xff]  }
  0x71   :  { %2332 = vmatprep.subr.bf16.mxu0 %v2503_v13  ;;  %1073 = vmatmul.mubr.bf16.gmra.mrb[24].mxu1 %v2787_v16 }
  0x72   :  { %1080 = vmatprep.mubr.bf16.mxu1 %v2835_v27  ;;  %v844_v9 = vor.u32 %v843_v36, %v840_v21  ;;  %v1852_v21 = vld [vmem:[%s3119_s4] sm:$0xff] }
  0x73   :  { %1512 = vmatmul.mubr.bf16.gmra.mrb[28].mxu0 %v2787_v16  ;;  %v1678_v16 = vld [vmem:[%s3118_s3 + $0x10] sm:$0xff]  ;;  %2313 = vmatpush3.bf16.msra.mxu1 %v2508_v49 }
  0x74   :  { %2333 = vmatpush3.bf16.msra.mxu0 %v2503_v13  ;;  %1519 = vmatprep.mubr.bf16.mxu0 %v2835_v27  ;;  %v2015_v27 = vcombine.low %v2765_v50, %v2770_v1  ;;  %v2511_v50 = vld [vmem:[#allocation3 + $0x228] sm:$0xff]   ;;  %v2964_v1 = vsel %vm281_vm2, %v2827_v11, %v2955_v62  ;;  %v825_v11 = vor.u32 %v824_v53, %v821_v28 }
  0x75   :  { %2334 = vmatprep.subr.bf16.mxu0 %v2505_v24  ;;  %1700 = vperm.xlu1 %2423, %v1678_v16   ;;  %v845_v38 = vsel %vm281_vm2, %v2809_v26, %v844_v9  ;;  %v1680_v26 = vld [vmem:[%s3118_s3 + $0x20] sm:$0xff]  ;;  %v1298_v16 = vrot.slane %v1296_v2, 4 }
  0x76   :  { %2314 = vmatprep.subr.bf16.mxu1 %v2510_v20  ;;  %v1266_v13 = vshrl.u32 %v2015_v27, 16  ;;  %v1269_v5 = vshll.u32 %v2015_v27, 16  ;;  %v834_v12 = vsel %vm281_vm2, %v825_v11, %v2910_v19  ;;  %v1293_v19 = vshrl.u32 %v2016_v6, 16  ;;  %1710 = vperm.xlu0 %2422, %v1680_v26   ;;  %v1855_v27 = vld [vmem:[%s3119_s4 + $0x18] sm:$0xff]  ;;  %v1856_v28 = vld [vmem:[%s3119_s4 + $0x20] sm:$0xff] }
  0x77   :  { %2315 = vmatpush3.bf16.msra.mxu1 %v2510_v20  ;;  %v1257_v20 = vshrl.u32 %v2645_v54, 16 }
  0x78   :  { %2335 = vmatpush3.bf16.msra.mxu0 %v2505_v24  ;;  %v2513_v24 = vld [vmem:[#allocation3 + $0x230] sm:$0xff]   ;;  %v1268_v31 = vrot.slane %v1266_v13, 3  ;;  %v1271_v49 = vrot.slane %v1269_v5, 4  ;;  %v1295_v32 = vrot.slane %v1293_v19, 3 }
  0x79   :  { %2336 = vmatprep.subr.bf16.mxu0 %v2509_v35  ;;  %1081 = vmatmul.mubr.bf16.gmra.mrb[28].mxu1 %v2820_v46  ;;  %v1259_v54 = vrot.slane %v1257_v20, 3 }
  0x7a   :  { %1088 = vmatprep.mubr.bf16.mxu1 %v854_v55  ;;  %1705 = vperm.xlu1 %2423, %v1679_v61   ;;  %v1299_v8 = vor.u32 %v1298_v16, %v1295_v32  ;;  %v1857_v55 = vld [vmem:[%s3119_s4 + $0x28] sm:$0xff]  ;;  %v2570_v61 = vmov 0.0  }
  0x7b   :  { %1520 = vmatmul.mubr.bf16.gmra.mrb[32].mxu0 %v2820_v46  ;;  %v1302_v46 = vshrl.u32 %v2927_v10, 16  ;;  %v1282_v10 = vsel %vm281_vm2, %v2868_v59, %v1281_v51  ;;  %v1272_v59 = vor.u32 %v1271_v49, %v1268_v31  ;;  %v1263_v52 = vor.u32 %v1262_v58, %v1259_v54  ;;  %1760 = vst [vmem:[#allocation2] sm:$0xff] %v2570_v61 }
  0x7c   :  { %1527 = vmatprep.mubr.bf16.mxu0 %v2875_v63  ;;  %2337 = vmatpush3.bf16.msra.mxu0 %v2509_v35  ;;  %v1681_v63 = vld [vmem:[%s3118_s3 + $0x28] sm:$0xff]  ;;  %1773 = vst [vmem:[#allocation2 + $0x68] sm:$0xff] %v2570_v61  ;;  %1774 = vst [vmem:[#allocation2 + $0x70] sm:$0xff] %v2570_v61 }
  0x7d   :  { %2338 = vmatprep.subr.bf16.mxu0 %v2511_v50  ;;  %v1304_v22 = vrot.slane %v1302_v46, 3  ;;  %v1273_v56 = vsel %vm281_vm2, %v2860_v30, %v1272_v59  ;;  %v1687_v30 = vld [vmem:[%s3118_s3 + $0x58] sm:$0xff]  ;;  %v1300_v33 = vsel %vm281_vm2, %v1272_v59, %v1299_v8  ;;  %v1264_v37 = vsel %vm281_vm2, %v1263_v52, %v2704_v45 }
  0x7e   :  { %1715 = vperm.xlu1 %2423, %v1681_v63  }
  0x7f   :  { %v1308_v39 = vor.u32 %v1307_v17, %v1304_v22 }
  0x80   :  { %2339 = vmatpush3.bf16.msra.mxu0 %v2511_v50 }
  0x81   :  { %2340 = vmatprep.subr.bf16.mxu0 %v2513_v24  ;;  %1089 = vmatmul.mubr.bf16.gmra.mrb[32].mxu1 %v845_v38  ;;  %v1309_v35 = vsel %vm281_vm2, %v1281_v51, %v1308_v39 }
  0x82   :  { %2316 = vmatprep.mubr.bf16.mxu1 %v834_v12  ;;  %1725 = vperm.xlu1 %2423, %v1683_v0  }
  0x83   :  { %1528 = vmatmul.mubr.bf16.gmra.mrb[36].mxu0 %v2865_v57  ;;  %v1682_v57 = vld [vmem:[%s3118_s3 + $0x30] sm:$0xff] }
  0x84   :  { %1535 = vmatprep.mubr.bf16.mxu0 %v1282_v10  ;;  %2341 = vmatpush3.bf16.msra.mxu0 %v2513_v24 }
  0x85   :  { %2342 = vmatprep.subr.bf16.mxu0 %v2515_v23  ;;  %1720 = vperm.xlu0 %2422, %v1682_v57  }
  0x86   :  { %1735 = vperm.xlu1 %2423, %v1685_v60  }
  0x88   :  { %2343 = vmatpush3.bf16.msra.mxu0 %v2515_v23 }
  0x89   :  { %2317 = vmatmul.mubr.bf16.vlgmr.msra.gmra.mrb[0].mxu1 %v2922_v14  ;;  %1730 = vperm.xlu0 %2422, %v1684_v18   ;;  %v1853_v14 = vld [vmem:[%s3119_s4 + $0x8] sm:$0xff] }
  0x8a   :  { %2320 = vmatprep.mubr.bf16.mxu1 %v2712_v47  ;;  %1745 = vperm.xlu1 %2423, %v1687_v30   ;;  %v2517_v47 = vld [vmem:[%s3115_s0 + $0x48] ss:$0 sps:$4 sm:$0x11]  }
  0x8b   :  { %1536 = vmatmul.mubr.bf16.gmra.mrb[40].mxu0 %v1273_v56  ;;  %v1197_v45 = vrot.slane %v2517_v47, 5 }
  0x8c   :  { %1543 = vmatprep.mubr.bf16.mxu0 %v1309_v35 }
  0x8d   :  { %1740 = vperm.xlu0 %2422, %v1686_v15   ;;  %v1198_v36 = vsel %vm150_vm1, %v1195_v48, %v1197_v45 }
  0x8e   :  { %1865 = vperm.xlu1 %2423, %v1853_v14   ;;  %v1311_v53 = vshrl.u32 %v1198_v36, 16  ;;  %v1314_v40 = vshll.u32 %v1198_v36, 16 }
  0x90   :  { %v1313_v41 = vrot.slane %v1311_v53, 3  ;;  %v1316_v50 = vrot.slane %v1314_v40, 4 }
  0x91   :  { %2321 = vmatmul.mubr.bf16.gmra.mrb[4].mxu1 %v2774_v4  ;;  %1860 = vperm.xlu0 %2422, %v1852_v21  }
  0x92   :  { %2324 = vmatprep.mubr.bf16.mxu1 %v2796_v25  ;;  %1875 = vperm.xlu1 %2423, %v1855_v27   ;;  %v1317_v34 = vor.u32 %v1316_v50, %v1313_v41 }
  0x93   :  { %1544 = vmatmul.mubr.bf16.gmra.mrb[44].mxu0 %v1300_v33 }
  0x94   :  { %2344 = vmatprep.mubr.bf16.mxu0 %v1264_v37  ;;  %v1318_v48 = vsel %vm281_vm2, %v2955_v62, %v1317_v34 }
  0x95   :  { %1870 = vperm.xlu0 %2422, %v1854_v44  }
  0x96   :  { %1885 = vperm.xlu1 %2423, %v1857_v55  }
  0x99   :  { %2325 = vmatmul.mubr.bf16.gmra.mrb[8].mxu1 %v2959_v3  ;;  %1880 = vperm.xlu0 %2422, %v1856_v28  }
  0x9b   :  { %2345 = vmatmul.mubr.bf16.vlgmr.msra.gmra.mrb[48].mxu0 %v2774_v4 }
  0x9c   :  { %2348 = vmatprep.mubr.bf16.mxu0 %v2796_v25 }
  0xa3   :  { %2349 = vmatmul.mubr.bf16.gmra.mrb[52].mxu0 %v2841_v7 }
  0xa4   :  { %2352 = vmatprep.mubr.bf16.mxu0 %v2964_v1 }
  0xab   :  { %2353 = vmatmul.mubr.bf16.gmra.mrb[56].mxu0 %v1318_v48 }
 0x108   :  { %v2090_v4 = vpop.f32.mrb[0].mxu0 }
 0x109   :  { %v2091_v25 = vpop.f32.mrb[1].mxu0 }
 0x10a   :  { %v2092_v3 = vadd.f32 %v2091_v25, %v2090_v4  ;;  %v2093_v9 = vpop.f32.mrb[2].mxu0 }
 0x10b   :  { %v2094_v13 = vpop.f32.mrb[3].mxu0 }
 0x10c   :  { %v2095_v5 = vadd.f32 %v2094_v13, %v2093_v9 }
 0x113   :  { %v2096_v43 = vpop.f32.mrb[4].mxu0 }
 0x114   :  { %v2097_v11 = vpop.f32.mrb[5].mxu0 }
 0x115   :  { %v2098_v7 = vadd.f32 %v2097_v11, %v2096_v43  ;;  %v2099_v51 = vpop.f32.mrb[6].mxu0 }
 0x116   :  { %v2100_v1 = vpop.f32.mrb[7].mxu0 }
 0x117   :  { %v2101_v46 = vadd.f32 %v2100_v1, %v2099_v51 }
 0x11b   :  { %v2102_v42 = vpop.f32.mrb[8].mxu0 }
 0x11c   :  { %v2103_v24 = vpop.f32.mrb[9].mxu0 }
 0x11d   :  { %v2104_v62 = vadd.f32 %v2103_v24, %v2102_v42  ;;  %v2105_v63 = vpop.f32.mrb[10].mxu0 }
 0x11e   :  { %v2106_v38 = vpop.f32.mrb[11].mxu0 }
 0x11f   :  { %v2107_v31 = vadd.f32 %v2106_v38, %v2105_v63 }
 0x123   :  { %v2108_v49 = vpop.f32.mrb[12].mxu0 }
 0x124   :  { %v2109_v6 = vpop.f32.mrb[13].mxu0 }
 0x125   :  { %v2110_v12 = vadd.f32 %v2109_v6, %v2108_v49  ;;  %v2111_v10 = vpop.f32.mrb[14].mxu0 }
 0x126   :  { %v2112_v22 = vpop.f32.mrb[15].mxu0 }
 0x127   :  { %v2113_v17 = vadd.f32 %v2112_v22, %v2111_v10 }
 0x12c   :  { %v2156_v26 = vpop.f32.mrb[12].mxu1 }
 0x12d   :  { %v2157_v59 = vpop.f32.mrb[13].mxu1 }
 0x12e   :  { %v2114_v23 = vpop.f32.mrb[16].mxu0  ;;  %v2158_v2 = vadd.f32 %v2157_v59, %v2156_v26  ;;  %v2159_v20 = vpop.f32.mrb[14].mxu1 }
 0x12f   :  { %v2115_v0 = vpop.f32.mrb[17].mxu0  ;;  %v2160_v57 = vpop.f32.mrb[15].mxu1 }
 0x130   :  { %v3053_v19 = vadd.f32 %v2115_v0, %v2114_v23  ;;  %v2117_v39 = vpop.f32.mrb[18].mxu0  ;;  %v2161_v56 = vadd.f32 %v2160_v57, %v2159_v20  ;;  %v3055_v32 = vadd.f32 %v2158_v2, %v2092_v3 }
 0x131   :  { %v2118_v29 = vpop.f32.mrb[19].mxu0 }
 0x132   :  { %v2119_v60 = vadd.f32 %v2118_v29, %v2117_v39  ;;  %v3057_v16 = vadd.f32 %v2161_v56, %v2095_v5 }
 0x134   :  { %v2162_v54 = vpop.f32.mrb[16].mxu1 }
 0x135   :  { %v2163_v18 = vpop.f32.mrb[17].mxu1 }
 0x136   :  { %v2120_v35 = vpop.f32.mrb[20].mxu0  ;;  %v2164_v8 = vadd.f32 %v2163_v18, %v2162_v54  ;;  %v2165_v15 = vpop.f32.mrb[18].mxu1 }
 0x137   :  { %v2121_v58 = vpop.f32.mrb[21].mxu0  ;;  %v2166_v33 = vpop.f32.mrb[19].mxu1 }
 0x138   :  { %v3059_v30 = vadd.f32 %v2121_v58, %v2120_v35  ;;  %v2123_v52 = vpop.f32.mrb[22].mxu0  ;;  %v2167_v47 = vadd.f32 %v2166_v33, %v2165_v15  ;;  %v2356_v21 = vadd.f32 %v2164_v8, %v2098_v7 }
 0x139   :  { %v2124_v14 = vpop.f32.mrb[23].mxu0 }
 0x13a   :  { %v2125_v37 = vadd.f32 %v2124_v14, %v2123_v52  ;;  %v3061_v27 = vadd.f32 %v2167_v47, %v2101_v46 }
 0x13c   :  { %v2168_v45 = vpop.f32.mrb[20].mxu1 }
 0x13d   :  { %v2169_v55 = vpop.f32.mrb[21].mxu1 }
 0x13e   :  { %v2222_v44 = vpop.f32.mrb[24].mxu0  ;;  %v2170_v28 = vadd.f32 %v2169_v55, %v2168_v45  ;;  %v2171_v40 = vpop.f32.mrb[22].mxu1 }
 0x13f   :  { %v2223_v36 = vpop.f32.mrb[25].mxu0  ;;  %v2172_v50 = vpop.f32.mrb[23].mxu1 }
 0x140   :  { %v3063_v53 = vadd.f32 %v2223_v36, %v2222_v44  ;;  %v2225_v41 = vpop.f32.mrb[26].mxu0  ;;  %v2173_v48 = vadd.f32 %v2172_v50, %v2171_v40  ;;  %v3065_v4 = vadd.f32 %v2170_v28, %v2104_v62 }
 0x141   :  { %v2226_v34 = vpop.f32.mrb[27].mxu0 }
 0x142   :  { %v2227_v61 = vadd.f32 %v2226_v34, %v2225_v41  ;;  %v3067_v25 = vadd.f32 %v2173_v48, %v2107_v31 }
 0x144   :  { %v2174_v3 = vpop.f32.mrb[24].mxu1 }
 0x145   :  { %v2175_v13 = vpop.f32.mrb[25].mxu1 }
 0x146   :  { %v2228_v9 = vpop.f32.mrb[28].mxu0  ;;  %v2176_v43 = vadd.f32 %v2175_v13, %v2174_v3  ;;  %v2177_v7 = vpop.f32.mrb[26].mxu1 }
 0x147   :  { %v2229_v5 = vpop.f32.mrb[29].mxu0  ;;  %v2178_v1 = vpop.f32.mrb[27].mxu1 }
 0x148   :  { %v2230_v11 = vadd.f32 %v2229_v5, %v2228_v9  ;;  %v2231_v51 = vpop.f32.mrb[30].mxu0  ;;  %v2179_v42 = vadd.f32 %v2178_v1, %v2177_v7  ;;  %v2372_v63 = vadd.f32 %v2176_v43, %v2110_v12  ;;  %v1691_v43 = vpop.permute.xlu0 %1690 }
 0x149   :  { %v2232_v46 = vpop.f32.mrb[31].mxu0 }
 0x14a   :  { %v2233_v24 = vadd.f32 %v2232_v46, %v2231_v51  ;;  %v2380_v38 = vadd.f32 %v2179_v42, %v2113_v17 }
 0x14c   :  { %v2180_v49 = vpop.f32.mrb[28].mxu1 }
 0x14d   :  { %v2181_v62 = vpop.f32.mrb[29].mxu1 }
 0x14e   :  { %v2234_v6 = vpop.f32.mrb[32].mxu0  ;;  %v2182_v31 = vadd.f32 %v2181_v62, %v2180_v49  ;;  %v2183_v23 = vpop.f32.mrb[30].mxu1 }
 0x14f   :  { %v2235_v10 = vpop.f32.mrb[33].mxu0  ;;  %v2184_v0 = vpop.f32.mrb[31].mxu1 }
 0x150   :  { %v2236_v22 = vadd.f32 %v2235_v10, %v2234_v6  ;;  %v2237_v26 = vpop.f32.mrb[34].mxu0  ;;  %v2185_v2 = vadd.f32 %v2184_v0, %v2183_v23  ;;  %v3070_v20 = vadd.f32 %v2182_v31, %v3053_v19  ;;  %v1696_v23 = vpop.permute.xlu0 %1695 }
 0x151   :  { %v2238_v59 = vpop.f32.mrb[35].mxu0 }
 0x152   :  { %v2239_v39 = vadd.f32 %v2238_v59, %v2237_v26  ;;  %v3072_v29 = vadd.f32 %v2185_v2, %v2119_v60 }
 0x154   :  { %v2186_v57 = vpop.f32.mrb[32].mxu1 }
 0x155   :  { %v2187_v17 = vpop.f32.mrb[33].mxu1 }
 0x156   :  { %v2240_v12 = vpop.f32.mrb[36].mxu0  ;;  %v2188_v35 = vadd.f32 %v2187_v17, %v2186_v57  ;;  %v2189_v58 = vpop.f32.mrb[34].mxu1 }
 0x157   :  { %v2241_v56 = vpop.f32.mrb[37].mxu0  ;;  %v2190_v8 = vpop.f32.mrb[35].mxu1 }
 0x158   :  { %v2242_v54 = vadd.f32 %v2241_v56, %v2240_v12  ;;  %v2243_v18 = vpop.f32.mrb[38].mxu0  ;;  %v2191_v15 = vadd.f32 %v2190_v8, %v2189_v58  ;;  %v2388_v33 = vadd.f32 %v2188_v35, %v3059_v30 }
 0x159   :  { %v2244_v52 = vpop.f32.mrb[39].mxu0 }
 0x15a   :  { %v2245_v14 = vadd.f32 %v2244_v52, %v2243_v18  ;;  %v2396_v47 = vadd.f32 %v2191_v15, %v2125_v37  ;;  %v1711_v52 = vpop.permute.xlu0 %1710 }
 0x15c   :  { %v2318_v45 = vpop.f32.mrb[0].mxu1 }
 0x15d   :  { %v2357_v44 = vadd.f32 %v2356_v21, %v2318_v45  ;;  %v1131_v60 = vpop.f32.mrb[1].mxu1  ;;  %v1701_v21 = vpop.permute.xlu1 %1700 }
 0x15e   :  { %v2246_v19 = vpop.f32.mrb[40].mxu0  ;;  %v2361_v36 = vadd.f32 %v3055_v32, %v1131_v60  ;;  %v2319_v40 = vpop.f32.mrb[2].mxu1 }
 0x15f   :  { %v2247_v55 = vpop.f32.mrb[41].mxu0  ;;  %v2365_v50 = vadd.f32 %v3061_v27, %v2319_v40  ;;  %v1134_v34 = vpop.f32.mrb[3].mxu1  ;;  %v2358_v3 = vadd.f32 %v2357_v44, %v2230_v11 }
 0x160   :  { %v2248_v28 = vadd.f32 %v2247_v55, %v2246_v19  ;;  %v2249_v41 = vpop.f32.mrb[42].mxu0  ;;  %v2369_v9 = vadd.f32 %v3057_v16, %v1134_v34  ;;  %v2362_v30 = vadd.f32 %v2361_v36, %v3063_v53 }
 0x161   :  { %v2250_v48 = vpop.f32.mrb[43].mxu0  ;;  %v2366_v37 = vadd.f32 %v2365_v50, %v2233_v24  ;;  %v1706_v0 = vpop.permute.xlu1 %1705 }
 0x162   :  { %v2251_v13 = vadd.f32 %v2250_v48, %v2249_v41  ;;  %v2370_v5 = vadd.f32 %v2369_v9, %v2227_v61 }
 0x164   :  { %v2322_v7 = vpop.f32.mrb[4].mxu1 }
 0x165   :  { %v2373_v32 = vadd.f32 %v2372_v63, %v2322_v7  ;;  %v1147_v1 = vpop.f32.mrb[5].mxu1  ;;  %v1716_v60 = vpop.permute.xlu1 %1715 }
 0x166   :  { %v2252_v51 = vpop.f32.mrb[44].mxu0  ;;  %v2377_v42 = vadd.f32 %v3065_v4, %v1147_v1  ;;  %v2323_v49 = vpop.f32.mrb[6].mxu1  ;;  %v3084_v4 = vld [vmem:[%s3117_s2] ss:$0 sm:$0xff]  ;;  %s2571_s2 = smov [#allocation6]  }
 0x167   :  { %v2253_v46 = vpop.f32.mrb[45].mxu0  ;;  %v2381_v11 = vadd.f32 %v2380_v38, %v2323_v49  ;;  %v1150_v62 = vpop.f32.mrb[7].mxu1  ;;  %v2374_v10 = vadd.f32 %v2373_v32, %v2242_v54  ;;  %s1937_s6 = sshll.u32 %s2571_s2, 4  ;;  %s1938_s6 = int_to_ptr.vmem [resolvable:$true] %s1937_s6 }
 0x168   :  { %v2254_v27 = vadd.f32 %v2253_v46, %v2252_v51  ;;  %v2255_v6 = vpop.f32.mrb[46].mxu0  ;;  %v2385_v53 = vadd.f32 %v3067_v25, %v1150_v62  ;;  %v2378_v61 = vadd.f32 %v2377_v42, %v2236_v22  ;;  %s2540_s1 = scalar_lea.vmem %s1938_s6, 896  ;;  %p2545_p9 = scmp.lt.s32.totalorder %s1938_s6, %s1938_s6 }
 0x169   :  { %v2256_v16 = vpop.f32.mrb[47].mxu0  ;;  %v2382_v31 = vadd.f32 %v2381_v11, %v2245_v14  ;;  %p2541_p8 = scmp.ne.s32.totalorder %s1938_s6, %s2540_s1  ;;  %p2546_p10 = scmp.lt.s32.totalorder %s2540_s1, %s2540_s1 }
 0x16a   :  { %v2257_v24 = vadd.f32 %v2256_v16, %v2255_v6  ;;  %v2386_v26 = vadd.f32 %v2385_v53, %v2239_v39 }
 0x16b   :  { %p2547_p11 = por %p2546_p10, %p2545_p9 }
 0x16c   :  { %v2326_v63 = vpop.f32.mrb[8].mxu1 }
 0x16d   :  { %v2389_v2 = vadd.f32 %v2388_v33, %v2326_v63  ;;  %v1163_v57 = vpop.f32.mrb[9].mxu1  ;;  %p2548_p12 = pnand %p2547_p11, %p2541_p8 }
 0x16e   :  { %v2346_v59 = vpop.f32.mrb[48].mxu0  ;;  %v2393_v17 = vadd.f32 %v3070_v20, %v1163_v57  ;;  %v2327_v56 = vpop.f32.mrb[10].mxu1 }
 0x16f   :  { %v2359_v38 = vadd.f32 %v2358_v3, %v2346_v59  ;;  %v1586_v12 = vpop.f32.mrb[49].mxu0  ;;  %v2397_v39 = vadd.f32 %v2396_v47, %v2327_v56  ;;  %v1166_v58 = vpop.f32.mrb[11].mxu1  ;;  %v2390_v8 = vadd.f32 %v2389_v2, %v2254_v27 }
 0x170   :  { %v2363_v25 = vadd.f32 %v2362_v30, %v1586_v12  ;;  %v2347_v22 = vpop.f32.mrb[50].mxu0  ;;  %v2401_v14 = vadd.f32 %v3072_v29, %v1166_v58  ;;  %v2394_v45 = vadd.f32 %v2393_v17, %v2248_v28  ;;  %v1721_v30 = vpop.permute.xlu0 %1720 }
 0x171   :  { %v1654_v35 = vadd.f32 %v2359_v38, %v3084_v4  ;;  %v2367_v54 = vadd.f32 %v2366_v37, %v2347_v22  ;;  %v1589_v18 = vpop.f32.mrb[51].mxu0  ;;  %v2398_v44 = vadd.f32 %v2397_v39, %v2257_v24 }
 0x172   :  { %v1652_v15 = vadd.f32 %v2363_v25, %v3084_v4  ;;  %v2371_v33 = vadd.f32 %v2370_v5, %v1589_v18  ;;  %v2402_v47 = vadd.f32 %v2401_v14, %v2251_v13  ;;  %v1726_v13 = vpop.permute.xlu1 %1725 }
 0x173   :  { %v1666_v19 = vmax.f32 %v1654_v35, 0.0  ;;  %v1655_v20 = vadd.f32 %v2367_v54, %v3084_v4 }
 0x174   :  { %v1664_v55 = vmax.f32 %v1652_v15, 0.0  ;;  %v1653_v36 = vadd.f32 %v2371_v33, %v3084_v4  ;;  %v1731_v11 = vpop.permute.xlu0 %1730 }
 0x175   :  { %v1750_v40 = vmul.f32 %v1701_v21, %v1666_v19  ;;  %v1667_v41 = vmax.f32 %v1655_v20, 0.0 }
 0x176   :  { %v1748_v50 = vmul.f32 %v1691_v43, %v1664_v55  ;;  %v1665_v34 = vmax.f32 %v1653_v36, 0.0  ;;  %v2350_v48 = vpop.f32.mrb[52].mxu0 }
 0x177   :  { %1763 = vst [vmem:[#allocation2 + $0x18] sm:$0xff] %v1750_v40  ;;  %v1751_v3 = vmul.f32 %v1706_v0, %v1667_v41  ;;  %v2375_v9 = vadd.f32 %v2374_v10, %v2350_v48  ;;  %v1602_v29 = vpop.f32.mrb[53].mxu0 }
 0x178   :  { %1761 = vst [vmem:[#allocation2 + $0x8] sm:$0xff] %v1748_v50  ;;  %v1749_v28 = vmul.f32 %v1696_v23, %v1665_v34  ;;  %v2379_v37 = vadd.f32 %v2378_v61, %v1602_v29  ;;  %v2351_v5 = vpop.f32.mrb[54].mxu0  ;;  %v1736_v23 = vpop.permute.xlu1 %1735  ;;  %v1788_v29 = vld [vmem:[#allocation2 + $0x6f] sm:$0xff] }
 0x179   :  { %1764 = vst [vmem:[#allocation2 + $0x20] sm:$0xff] %v1751_v3  ;;  %v1658_v7 = vadd.f32 %v2375_v9, %v3084_v4  ;;  %v2383_v51 = vadd.f32 %v2382_v31, %v2351_v5  ;;  %v1605_v32 = vpop.f32.mrb[55].mxu0 }
 0x17a   :  { %1762 = vst [vmem:[#allocation2 + $0x10] sm:$0xff] %v1749_v28  ;;  %v1656_v21 = vadd.f32 %v2379_v37, %v3084_v4  ;;  %v2387_v43 = vadd.f32 %v2386_v26, %v1605_v32 }
 0x17b   :  { %v1670_v1 = vmax.f32 %v1658_v7, 0.0  ;;  %v1659_v46 = vadd.f32 %v2383_v51, %v3084_v4  ;;  %v1816_v7 = vmax.f32 %v1788_v29, 0.0 }
 0x17c   :  { %v1668_v42 = vmax.f32 %v1656_v21, 0.0  ;;  %v1657_v27 = vadd.f32 %v2387_v43, %v3084_v4  ;;  %v1746_v20 = vpop.permute.xlu1 %1745 }
 0x17d   :  { %v1754_v49 = vmul.f32 %v1721_v30, %v1670_v1  ;;  %v1671_v6 = vmax.f32 %v1659_v46, 0.0 }
 0x17e   :  { %v1752_v62 = vmul.f32 %v1711_v52, %v1668_v42  ;;  %v1669_v16 = vmax.f32 %v1657_v27, 0.0  ;;  %v2354_v10 = vpop.f32.mrb[56].mxu0 }
 0x17f   :  { %v1775_v53 = vld [vmem:[#allocation2 + $0x7] sm:$0xff]  ;;  %1767 = vst [vmem:[#allocation2 + $0x38] sm:$0xff] %v1754_v49  ;;  %v1755_v24 = vmul.f32 %v1726_v13, %v1671_v6  ;;  %v2391_v61 = vadd.f32 %v2390_v8, %v2354_v10  ;;  %v1618_v31 = vpop.f32.mrb[57].mxu0  ;;  %v1741_v8 = vpop.permute.xlu0 %1740 }
 0x180   :  { %v1778_v0 = vld [vmem:[#allocation2 + $0x1f] sm:$0xff]  ;;  %1765 = vst [vmem:[#allocation2 + $0x28] sm:$0xff] %v1752_v62  ;;  %v1753_v26 = vmul.f32 %v1716_v60, %v1669_v16  ;;  %v2395_v63 = vadd.f32 %v2394_v45, %v1618_v31  ;;  %v2355_v59 = vpop.f32.mrb[58].mxu0  ;;  %v1803_v2 = vmax.f32 %v1775_v53, %v1748_v50  ;;  %v1866_v21 = vpop.permute.xlu1 %1865 }
 0x181   :  { %v1776_v38 = vld [vmem:[#allocation2 + $0xf] sm:$0xff]  ;;  %v1777_v57 = vld [vmem:[#allocation2 + $0x17] sm:$0xff]  ;;  %1768 = vst [vmem:[#allocation2 + $0x40] sm:$0xff] %v1755_v24  ;;  %v1662_v12 = vadd.f32 %v2391_v61, %v3084_v4  ;;  %v2399_v17 = vadd.f32 %v2398_v44, %v2355_v59  ;;  %v1621_v25 = vpop.f32.mrb[59].mxu0  ;;  %v1806_v56 = vmax.f32 %v1778_v0, %v1751_v3 }
 0x182   :  { %v1804_v22 = vmax.f32 %v1776_v38, %v1749_v28  ;;  %v1805_v35 = vmax.f32 %v1777_v57, %v1750_v40  ;;  %1766 = vst [vmem:[#allocation2 + $0x30] sm:$0xff] %v1753_v26  ;;  %v1660_v39 = vadd.f32 %v2395_v63, %v3084_v4  ;;  %v2403_v54 = vadd.f32 %v2402_v47, %v1621_v25 }
 0x183   :  { %v1674_v58 = vmax.f32 %v1662_v12, 0.0  ;;  %v1663_v18 = vadd.f32 %v2399_v17, %v3084_v4  ;;  %v1861_v43 = vpop.permute.xlu0 %1860 }
 0x184   :  { %v1817_v52 = vmax.f32 %v1803_v2, %v1805_v35  ;;  %v1672_v15 = vmax.f32 %v1660_v39, 0.0  ;;  %v1661_v14 = vadd.f32 %v2403_v54, %v3084_v4  ;;  %v1818_v33 = vmax.f32 %v1804_v22, %v1806_v56 }
 0x185   :  { %v1758_v45 = vmul.f32 %v1741_v8, %v1674_v58  ;;  %v1675_v19 = vmax.f32 %v1663_v18, 0.0 }
 0x186   :  { %1829 = vst [vmem:[#allocation2] sm:$0xff] %v1817_v52  ;;  %v1756_v44 = vmul.f32 %v1731_v11, %v1672_v15  ;;  %v1673_v60 = vmax.f32 %v1661_v14, 0.0  ;;  %1830 = vst [vmem:[#allocation2 + $0x8] sm:$0xff] %v1818_v33 }
 0x187   :  { %v1779_v55 = vld [vmem:[#allocation2 + $0x27] sm:$0xff]  ;;  %1771 = vst [vmem:[#allocation2 + $0x58] sm:$0xff] %v1758_v45  ;;  %v1759_v36 = vmul.f32 %v1746_v20, %v1675_v19  ;;  %v1871_v63 = vpop.permute.xlu0 %1870 }
 0x188   :  { %1769 = vst [vmem:[#allocation2 + $0x48] sm:$0xff] %v1756_v44  ;;  %v1757_v47 = vmul.f32 %v1736_v23, %v1673_v60  ;;  %v1782_v40 = vld [vmem:[#allocation2 + $0x3f] sm:$0xff]  ;;  %v1807_v41 = vmax.f32 %v1779_v55, %v1752_v62 }
 0x189   :  { %1772 = vst [vmem:[#allocation2 + $0x60] sm:$0xff] %v1759_v36  ;;  %v1780_v50 = vld [vmem:[#allocation2 + $0x2f] sm:$0xff]  ;;  %v1781_v34 = vld [vmem:[#allocation2 + $0x37] sm:$0xff]  ;;  %v1810_v48 = vmax.f32 %v1782_v40, %v1755_v24 }
 0x18a   :  { %1770 = vst [vmem:[#allocation2 + $0x50] sm:$0xff] %v1757_v47  ;;  %v1808_v4 = vmax.f32 %v1780_v50, %v1753_v26  ;;  %v1809_v3 = vmax.f32 %v1781_v34, %v1754_v49  ;;  %v1819_v9 = vmax.f32 %v1805_v35, %v1807_v41  ;;  %v1876_v26 = vpop.permute.xlu1 %1875 }
 0x18b   :  { %v1881_v57 = vpop.permute.xlu0 %1880 }
 0x18c   :  { %v1820_v30 = vmax.f32 %v1806_v56, %v1808_v4  ;;  %v1821_v28 = vmax.f32 %v1807_v41, %v1809_v3  ;;  %v1822_v37 = vmax.f32 %v1808_v4, %v1810_v48  ;;  %1831 = vst [vmem:[#allocation2 + $0x10] sm:$0xff] %v1819_v9 }
 0x18d   :  { %v1841_v16 = vld [vmem:[#allocation2] ss:$2 sm:$0xff] }
 0x18e   :  { %1832 = vst [vmem:[#allocation2 + $0x18] sm:$0xff] %v1820_v30  ;;  %1833 = vst [vmem:[#allocation2 + $0x20] sm:$0xff] %v1821_v28  ;;  %v1888_v23 = vmul.f32 %v1861_v43, %v1841_v16  ;;  %v1886_v38 = vpop.permute.xlu1 %1885 }
 0x18f   :  { %1834 = vst [vmem:[#allocation2 + $0x28] sm:$0xff] %v1822_v37  ;;  %v1783_v5 = vld [vmem:[#allocation2 + $0x47] sm:$0xff] }
 0x190   :  { %v1786_v51 = vld [vmem:[#allocation2 + $0x5f] sm:$0xff]  ;;  %v1787_v32 = vld [vmem:[#allocation2 + $0x67] sm:$0xff]  ;;  %v1811_v13 = vmax.f32 %v1783_v5, %v1756_v44 }
 0x191   :  { %v1784_v1 = vld [vmem:[#allocation2 + $0x4f] sm:$0xff]  ;;  %v1785_v46 = vld [vmem:[#allocation2 + $0x57] sm:$0xff]  ;;  %v1814_v42 = vmax.f32 %v1786_v51, %v1759_v36  ;;  %v1815_v27 = vmax.f32 %v1787_v32, 0.0 }
 0x192   :  { %v1812_v49 = vmax.f32 %v1784_v1, %v1757_v47  ;;  %v1813_v6 = vmax.f32 %v1785_v46, %v1758_v45  ;;  %v1823_v11 = vmax.f32 %v1809_v3, %v1811_v13 }
 0x193   :  { %v1828_v62 = vmax.f32 %v1814_v42, %v1816_v7 }
 0x194   :  { %v1824_v10 = vmax.f32 %v1810_v48, %v1812_v49  ;;  %v1825_v53 = vmax.f32 %v1811_v13, %v1813_v6  ;;  %v1826_v24 = vmax.f32 %v1812_v49, %v1814_v42  ;;  %v1827_v61 = vmax.f32 %v1813_v6, %v1815_v27  ;;  %1835 = vst [vmem:[#allocation2 + $0x30] sm:$0xff] %v1823_v11 }
 0x195   :  { %1840 = vst [vmem:[#allocation2 + $0x58] sm:$0xff] %v1828_v62  ;;  %v1843_v31 = vld [vmem:[#allocation2 + $0x10] ss:$2 sm:$0xff] }
 0x196   :  { %1836 = vst [vmem:[#allocation2 + $0x38] sm:$0xff] %v1824_v10  ;;  %1837 = vst [vmem:[#allocation2 + $0x40] sm:$0xff] %v1825_v53  ;;  %v1889_v0 = vmul.f32 %v1866_v21, %v1843_v31  ;;  %v1845_v2 = vld [vmem:[#allocation2 + $0x20] ss:$2 sm:$0xff] }
 0x197   :  { %1838 = vst [vmem:[#allocation2 + $0x48] sm:$0xff] %v1826_v24  ;;  %1839 = vst [vmem:[#allocation2 + $0x50] sm:$0xff] %v1827_v61  ;;  %v1890_v56 = vmul.f32 %v1871_v63, %v1845_v2 }
 0x198   :  { %v2059_v59 = vpack.c.bf16 %v1889_v0, %v1888_v23 }
 0x19a   :  { %2071 = vst [vmem:[#allocation6 + $0x10] sm:$0xff] %v2059_v59  }
 0x19d   :  { %v1847_v12 = vld [vmem:[#allocation2 + $0x30] ss:$2 sm:$0xff] }
 0x19e   :  { %v1849_v17 = vld [vmem:[#allocation2 + $0x40] ss:$2 sm:$0xff]  ;;  %v1851_v25 = vld [vmem:[#allocation2 + $0x50] ss:$2 sm:$0xff]  ;;  %v1891_v22 = vmul.f32 %v1876_v26, %v1847_v12 }
 0x19f   :  { %v1892_v35 = vmul.f32 %v1881_v57, %v1849_v17  ;;  %v1893_v39 = vmul.f32 %v1886_v38, %v1851_v25 }
 0x1a0   :  { %v2064_v54 = vpack.c.bf16 %v1891_v22, %v1890_v56 }
 0x1a1   :  { %v2069_v58 = vpack.c.bf16 %v1893_v39, %v1892_v35 }
 0x1a2   :  { %2072 = vst [vmem:[#allocation6 + $0x18] sm:$0xff] %v2064_v54  }
 0x1a3   :  { %2073 = vst [vmem:[#allocation6 + $0x20] sm:$0xff] %v2069_v58  }
 0x1a4   :  { %2551 = shalt.err (!%p2548_p12)
}
 0x1a5   :  { %s2552_s9 = scalar_lea.hbm %s3120_s5, 896 }
 0x1a6   :  { %p2553_p13 = scmp.ne.s32.totalorder %s3120_s5, %s2552_s9  ;;  %p2556_p0 = scmp.lt.u32.totalorder %s2552_s9, %s3120_s5 }
 0x1a8   :  { %p2558_p1 = pnand %p2556_p0, %p2553_p13 }
 0x1aa   :  { %2561 = shalt.err (!%p2558_p1)
}
 0x1ab   :  { %1943 = dma.vmem_to_hbm [thread:$0]  %s1938_s6, 896, %s3120_s5, [#allocation5], %s2567_s28, %s2567_s28, %s2568_s29  }
 0x1ac   :  { %2564 = dma.done.wait [#allocation5], 896  }
 0x1ad   :  { %2565 = vsyncadd [#allocation5], 4294966400 }
 0x1ae   :  { %1947 = vsyncpa [#allocation4], 1 }
 0x1af   :  { %1948 = vsyncpa [#allocation5], 1 }

</bundles_post_ra>
